<compile_context>
chip_gen: v6e
topology: v6e:2x2x1
jax: 0.10.0
libtpu: 0.0.40
codegen_flags: <defaults>
</compile_context>

<pallas_src>
import jax
import jax.numpy as jnp
from jax.experimental import pallas as pl
from jax.experimental.pallas import tpu as pltpu

BN_EPS = 1e-5
SLAB = 128  # channel sub-slab (one vreg of lanes) processed at a time


def _reduce_nhw(v):
    # (N, H, W, C) -> (1, 1, 1, C).
    # Sum the leading (vreg-replicated) N and H axes first with plain VPU adds
    # and only then do the cross-sublane W reduction (XLU) on a (1,1,W,C) slab.
    v = jnp.sum(v, axis=0, keepdims=True)
    v = jnp.sum(v, axis=1, keepdims=True)
    v = jnp.sum(v, axis=2, keepdims=True)
    return v


def dwconv_bn_kernel(x_ref, w_ref, g_ref, b_ref, o_ref):
    # x_ref: (N, H+2p, W+2p, TC)  spatially + channel padded input block
    # w_ref: (KH, KW, TC)         depthwise weights for this channel block
    # g_ref: (1, TC)              batchnorm gamma
    # b_ref: (1, TC)              batchnorm beta
    # o_ref: (N, H, W, TC)        output block
    N, H, W, TC = o_ref.shape
    KH, KW, _ = w_ref.shape
    n_slabs = TC // SLAB
    inv_cnt = 1.0 / float(N * H * W)

    # Process one 128-lane channel slab at a time so the live accumulator
    # stays small (~N*H vregs) even when the channel block is large.
    for s in range(n_slabs):
        c0 = s * SLAB
        csl = slice(c0, c0 + SLAB)

        w = w_ref[:, :, csl]  # (KH, KW, SLAB), ~KH vregs

        # Depthwise 5x5 conv: 25 shifted elementwise multiply-accumulates on
        # the VPU.  H/N offsets index leading dims (aligned vreg selection);
        # only the kw offset shifts along the sublane (W) axis.
        acc = x_ref[:, 0:H, 0:W, csl] * w[0, 0, :]
        for kh in range(KH):
            for kw in range(KW):
                if kh == 0 and kw == 0:
                    continue
                acc = acc + x_ref[:, kh:kh + H, kw:kw + W, csl] * w[kh, kw, :]

        # BatchNorm2d with training-mode (biased) batch statistics.
        # Two-pass: mean, then mean of squared deviations — avoids the
        # catastrophic cancellation of E[x^2] - mean^2; acc is already live in
        # registers, so the second sweep is cheap.
        mean = _reduce_nhw(acc) * inv_cnt                    # (1,1,1,SLAB)
        centered = acc - mean
        var = _reduce_nhw(centered * centered) * inv_cnt     # (1,1,1,SLAB)

        gamma = g_ref[:, csl].reshape(1, 1, 1, SLAB)
        beta = b_ref[:, csl].reshape(1, 1, 1, SLAB)
        # Padded channel lanes have gamma = 0 and var = 0; rsqrt(0 + eps) is
        # finite because eps > 0, so scale = 0 and the padded output is 0
        # (no inf * 0 NaNs).  Keep eps strictly positive here.
        scale = gamma * jax.lax.rsqrt(var + BN_EPS)

        # Lane-dense (128-aligned) store -> unmasked vst.
        o_ref[:, :, :, csl] = (centered * scale + beta).astype(o_ref.dtype)


def _ceil_to(x, m):
    return -(-x // m) * m


def _channel_tiling(C, per_channel_block_bytes, vmem_budget=8 << 20):
    """Pick (tc, n_blocks): tc a multiple of 128, n_blocks * tc >= C.

    Prefer few blocks (per-grid-step overhead dominates this tiny kernel) and,
    above one, an even count so v7x's two TensorCores get a balanced split.
    """
    if C <= 128:
        return 128, 1
    for n_blocks in (2, 4, 6, 8, 12, 16, 24, 32, 48, 64, 128):
        tc = _ceil_to(-(-C // n_blocks), 128)
        # Double-buffered per-block tiles must fit comfortably in VMEM.
        if 2 * tc * per_channel_block_bytes <= vmem_budget:
            return tc, n_blocks
    return 128, _ceil_to(C, 128) // 128


@jax.jit
def depthwise_conv_bn(x_nchw, w_dw, gamma, beta):
    """x_nchw: (N, C, H, W) f32; w_dw: (C, 1, KH, KW) PyTorch depthwise layout."""
    N, C, H, W = x_nchw.shape
    _, _, KH, KW = w_dw.shape
    pad = (KH - 1) // 2
    Hp, Wp = H + 2 * pad, W + 2 * pad

    per_channel_bytes = (N * Hp * Wp + N * H * W) * 4
    tc, n_blocks = _channel_tiling(C, per_channel_bytes)
    cp = tc * n_blocks
    cpad = cp - C

    # Layout plumbing stays in the wrapper: one transpose to NHWC, then a
    # single jnp.pad handling both the spatial halo and the channel padding.
    x_nhwc = jnp.transpose(x_nchw, (0, 2, 3, 1))
    x_pad = jnp.pad(x_nhwc, ((0, 0), (pad, pad), (pad, pad), (0, cpad)))
    # (C, 1, KH, KW) -> (KH, KW, C), channel-padded.
    w_khwc = jnp.transpose(w_dw[:, 0, :, :], (1, 2, 0))
    w_khwc = jnp.pad(w_khwc, ((0, 0), (0, 0), (0, cpad)))
    g2 = jnp.pad(gamma.reshape(1, C), ((0, 0), (0, cpad)))
    b2 = jnp.pad(beta.reshape(1, C), ((0, 0), (0, cpad)))

    out_nhwc = pl.pallas_call(
        dwconv_bn_kernel,
        out_shape=jax.ShapeDtypeStruct((N, H, W, cp), jnp.float32),
        grid_spec=pltpu.PrefetchScalarGridSpec(
            num_scalar_prefetch=0,
            grid=(n_blocks,),
            in_specs=[
                pl.BlockSpec((N, Hp, Wp, tc), lambda c: (0, 0, 0, c)),
                pl.BlockSpec((KH, KW, tc), lambda c: (0, 0, c)),
                pl.BlockSpec((1, tc), lambda c: (0, c)),
                pl.BlockSpec((1, tc), lambda c: (0, c)),
            ],
            out_specs=pl.BlockSpec((N, H, W, tc), lambda c: (0, 0, 0, c)),
        ),
        compiler_params=pltpu.CompilerParams(
            dimension_semantics=("parallel",),
        ),
    )(x_pad, w_khwc, g2, b2)

    # Drop channel padding, NHWC -> NCHW to match the PyTorch module contract.
    return jnp.transpose(out_nhwc[..., :C], (0, 3, 1, 2))


def _reference(x_nchw, w_dw, gamma, beta):
    """Pure-JAX reference (two-pass BN) for a correctness check."""
    N, C, H, W = x_nchw.shape
    KH, KW = w_dw.shape[2], w_dw.shape[3]
    pad = (KH - 1) // 2
    xp = jnp.pad(x_nchw, ((0, 0), (0, 0), (pad, pad), (pad, pad)))
    acc = jnp.zeros((N, C, H, W), jnp.float32)
    for kh in range(KH):
        for kw in range(KW):
            acc = acc + xp[:, :, kh:kh + H, kw:kw + W] * \
                w_dw[:, 0, kh, kw][None, :, None, None]
    mean = jnp.mean(acc, axis=(0, 2, 3), keepdims=True)
    var = jnp.mean((acc - mean) ** 2, axis=(0, 2, 3), keepdims=True)
    y = (acc - mean) * jax.lax.rsqrt(var + BN_EPS)
    return y * gamma[None, :, None, None] + beta[None, :, None, None]


if __name__ == "__main__":
    # Small shapes consistent with the module (original: N=1, C=1824, H=W=7).
    # C=200 exercises the channel-pad path (200 -> 256) and a 2-block channel
    # grid (tc=128, grid=(2,)) — the same structure the real shape gets
    # (C=1824 -> 2 blocks of tc=1024).
    N, C, H, W = 2, 200, 8, 8
    KH = KW = 5

    key = jax.random.PRNGKey(0)
    kx, kw_, kg, kb = jax.random.split(key, 4)

    x = jax.random.normal(kx, (N, C, H, W), dtype=jnp.float32)
    w = jax.random.normal(kw_, (C, 1, KH, KW), dtype=jnp.float32) * 0.1
    gamma = 1.0 + 0.1 * jax.random.normal(kg, (C,), dtype=jnp.float32)
    beta = 0.1 * jax.random.normal(kb, (C,), dtype=jnp.float32)

    out = depthwise_conv_bn(x, w, gamma, beta)
    jax.block_until_ready(out)
    assert out.shape == (N, C, H, W)

    ref = _reference(x, w, gamma, beta)
    assert jnp.allclose(out, ref, rtol=1e-3, atol=1e-3), \
        float(jnp.max(jnp.abs(out - ref)))

    print("KERNEL_OK")
</pallas_src>

<mosaic_0001>
module attributes {stable_mosaic.version = 11 : i64} {
  func.func @dwconv_bn_kernel(%arg0: i32, %arg1: memref<2x12x12x128xf32, #tpu.memory_space<vmem>>, %arg2: memref<5x5x128xf32, #tpu.memory_space<vmem>>, %arg3: memref<1x128xf32, #tpu.memory_space<vmem>>, %arg4: memref<1x128xf32, #tpu.memory_space<vmem>>, %arg5: memref<2x8x8x128xf32, #tpu.memory_space<vmem>>) attributes {dimension_semantics = [#tpu.dimension_semantics<parallel>], iteration_bounds = array<i64: 2>, scalar_prefetch = 0 : i64, scratch_operands = 0 : i64, tpu.core_type = #tpu.core_type<tc>, window_params = [{transform_indices = @transform_0, window_bounds = array<i64: 2, 12, 12, 128>}, {transform_indices = @transform_1, window_bounds = array<i64: 5, 5, 128>}, {transform_indices = @transform_2, window_bounds = array<i64: 1, 128>}, {transform_indices = @transform_3, window_bounds = array<i64: 1, 128>}, {transform_indices = @transform_4, window_bounds = array<i64: 2, 8, 8, 128>}]} {
    %c0 = arith.constant 0 : index
    %c0_0 = arith.constant 0 : index
    %c0_1 = arith.constant 0 : index
    %0 = vector.load %arg2[%c0, %c0_0, %c0_1] : memref<5x5x128xf32, #tpu.memory_space<vmem>>, vector<5x5x128xf32>
    %c0_2 = arith.constant 0 : index
    %c0_3 = arith.constant 0 : index
    %c0_4 = arith.constant 0 : index
    %c0_5 = arith.constant 0 : index
    %1 = vector.load %arg1[%c0_2, %c0_3, %c0_4, %c0_5] : memref<2x12x12x128xf32, #tpu.memory_space<vmem>>, vector<2x8x8x128xf32>
    %2 = vector.extract_strided_slice %0 {offsets = [0, 0, 0], sizes = [1, 1, 128], strides = [1, 1, 1]} : vector<5x5x128xf32> to vector<1x1x128xf32>
    %3 = vector.shape_cast %2 : vector<1x1x128xf32> to vector<128xf32>
    %4 = vector.shape_cast %3 : vector<128xf32> to vector<1x1x1x128xf32>
    %5 = vector.broadcast %4 : vector<1x1x1x128xf32> to vector<2x8x8x128xf32>
    %6 = arith.mulf %1, %5 : vector<2x8x8x128xf32>
    %c0_6 = arith.constant 0 : index
    %c0_7 = arith.constant 0 : index
    %c1 = arith.constant 1 : index
    %c0_8 = arith.constant 0 : index
    %7 = vector.load %arg1[%c0_6, %c0_7, %c1, %c0_8] : memref<2x12x12x128xf32, #tpu.memory_space<vmem>>, vector<2x8x8x128xf32>
    %8 = vector.extract_strided_slice %0 {offsets = [0, 1, 0], sizes = [1, 1, 128], strides = [1, 1, 1]} : vector<5x5x128xf32> to vector<1x1x128xf32>
    %9 = vector.shape_cast %8 : vector<1x1x128xf32> to vector<128xf32>
    %10 = vector.shape_cast %9 : vector<128xf32> to vector<1x1x1x128xf32>
    %11 = vector.broadcast %10 : vector<1x1x1x128xf32> to vector<2x8x8x128xf32>
    %12 = arith.mulf %7, %11 : vector<2x8x8x128xf32>
    %13 = arith.addf %6, %12 : vector<2x8x8x128xf32>
    %c0_9 = arith.constant 0 : index
    %c0_10 = arith.constant 0 : index
    %c2 = arith.constant 2 : index
    %c0_11 = arith.constant 0 : index
    %14 = vector.load %arg1[%c0_9, %c0_10, %c2, %c0_11] : memref<2x12x12x128xf32, #tpu.memory_space<vmem>>, vector<2x8x8x128xf32>
    %15 = vector.extract_strided_slice %0 {offsets = [0, 2, 0], sizes = [1, 1, 128], strides = [1, 1, 1]} : vector<5x5x128xf32> to vector<1x1x128xf32>
    %16 = vector.shape_cast %15 : vector<1x1x128xf32> to vector<128xf32>
    %17 = vector.shape_cast %16 : vector<128xf32> to vector<1x1x1x128xf32>
    %18 = vector.broadcast %17 : vector<1x1x1x128xf32> to vector<2x8x8x128xf32>
    %19 = arith.mulf %14, %18 : vector<2x8x8x128xf32>
    %20 = arith.addf %13, %19 : vector<2x8x8x128xf32>
    %c0_12 = arith.constant 0 : index
    %c0_13 = arith.constant 0 : index
    %c3 = arith.constant 3 : index
    %c0_14 = arith.constant 0 : index
    %21 = vector.load %arg1[%c0_12, %c0_13, %c3, %c0_14] : memref<2x12x12x128xf32, #tpu.memory_space<vmem>>, vector<2x8x8x128xf32>
    %22 = vector.extract_strided_slice %0 {offsets = [0, 3, 0], sizes = [1, 1, 128], strides = [1, 1, 1]} : vector<5x5x128xf32> to vector<1x1x128xf32>
    %23 = vector.shape_cast %22 : vector<1x1x128xf32> to vector<128xf32>
    %24 = vector.shape_cast %23 : vector<128xf32> to vector<1x1x1x128xf32>
    %25 = vector.broadcast %24 : vector<1x1x1x128xf32> to vector<2x8x8x128xf32>
    %26 = arith.mulf %21, %25 : vector<2x8x8x128xf32>
    %27 = arith.addf %20, %26 : vector<2x8x8x128xf32>
    %c0_15 = arith.constant 0 : index
    %c0_16 = arith.constant 0 : index
    %c4 = arith.constant 4 : index
    %c0_17 = arith.constant 0 : index
    %28 = vector.load %arg1[%c0_15, %c0_16, %c4, %c0_17] : memref<2x12x12x128xf32, #tpu.memory_space<vmem>>, vector<2x8x8x128xf32>
    %29 = vector.extract_strided_slice %0 {offsets = [0, 4, 0], sizes = [1, 1, 128], strides = [1, 1, 1]} : vector<5x5x128xf32> to vector<1x1x128xf32>
    %30 = vector.shape_cast %29 : vector<1x1x128xf32> to vector<128xf32>
    %31 = vector.shape_cast %30 : vector<128xf32> to vector<1x1x1x128xf32>
    %32 = vector.broadcast %31 : vector<1x1x1x128xf32> to vector<2x8x8x128xf32>
    %33 = arith.mulf %28, %32 : vector<2x8x8x128xf32>
    %34 = arith.addf %27, %33 : vector<2x8x8x128xf32>
    %c0_18 = arith.constant 0 : index
    %c1_19 = arith.constant 1 : index
    %c0_20 = arith.constant 0 : index
    %c0_21 = arith.constant 0 : index
    %35 = vector.load %arg1[%c0_18, %c1_19, %c0_20, %c0_21] : memref<2x12x12x128xf32, #tpu.memory_space<vmem>>, vector<2x8x8x128xf32>
    %36 = vector.extract_strided_slice %0 {offsets = [1, 0, 0], sizes = [1, 1, 128], strides = [1, 1, 1]} : vector<5x5x128xf32> to vector<1x1x128xf32>
    %37 = vector.shape_cast %36 : vector<1x1x128xf32> to vector<128xf32>
    %38 = vector.shape_cast %37 : vector<128xf32> to vector<1x1x1x128xf32>
    %39 = vector.broadcast %38 : vector<1x1x1x128xf32> to vector<2x8x8x128xf32>
    %40 = arith.mulf %35, %39 : vector<2x8x8x128xf32>
    %41 = arith.addf %34, %40 : vector<2x8x8x128xf32>
    %c0_22 = arith.constant 0 : index
    %c1_23 = arith.constant 1 : index
    %c1_24 = arith.constant 1 : index
    %c0_25 = arith.constant 0 : index
    %42 = vector.load %arg1[%c0_22, %c1_23, %c1_24, %c0_25] : memref<2x12x12x128xf32, #tpu.memory_space<vmem>>, vector<2x8x8x128xf32>
    %43 = vector.extract_strided_slice %0 {offsets = [1, 1, 0], sizes = [1, 1, 128], strides = [1, 1, 1]} : vector<5x5x128xf32> to vector<1x1x128xf32>
    %44 = vector.shape_cast %43 : vector<1x1x128xf32> to vector<128xf32>
    %45 = vector.shape_cast %44 : vector<128xf32> to vector<1x1x1x128xf32>
    %46 = vector.broadcast %45 : vector<1x1x1x128xf32> to vector<2x8x8x128xf32>
    %47 = arith.mulf %42, %46 : vector<2x8x8x128xf32>
    %48 = arith.addf %41, %47 : vector<2x8x8x128xf32>
    %c0_26 = arith.constant 0 : index
    %c1_27 = arith.constant 1 : index
    %c2_28 = arith.constant 2 : index
    %c0_29 = arith.constant 0 : index
    %49 = vector.load %arg1[%c0_26, %c1_27, %c2_28, %c0_29] : memref<2x12x12x128xf32, #tpu.memory_space<vmem>>, vector<2x8x8x128xf32>
    %50 = vector.extract_strided_slice %0 {offsets = [1, 2, 0], sizes = [1, 1, 128], strides = [1, 1, 1]} : vector<5x5x128xf32> to vector<1x1x128xf32>
    %51 = vector.shape_cast %50 : vector<1x1x128xf32> to vector<128xf32>
    %52 = vector.shape_cast %51 : vector<128xf32> to vector<1x1x1x128xf32>
    %53 = vector.broadcast %52 : vector<1x1x1x128xf32> to vector<2x8x8x128xf32>
    %54 = arith.mulf %49, %53 : vector<2x8x8x128xf32>
    %55 = arith.addf %48, %54 : vector<2x8x8x128xf32>
    %c0_30 = arith.constant 0 : index
    %c1_31 = arith.constant 1 : index
    %c3_32 = arith.constant 3 : index
    %c0_33 = arith.constant 0 : index
    %56 = vector.load %arg1[%c0_30, %c1_31, %c3_32, %c0_33] : memref<2x12x12x128xf32, #tpu.memory_space<vmem>>, vector<2x8x8x128xf32>
    %57 = vector.extract_strided_slice %0 {offsets = [1, 3, 0], sizes = [1, 1, 128], strides = [1, 1, 1]} : vector<5x5x128xf32> to vector<1x1x128xf32>
    %58 = vector.shape_cast %57 : vector<1x1x128xf32> to vector<128xf32>
    %59 = vector.shape_cast %58 : vector<128xf32> to vector<1x1x1x128xf32>
    %60 = vector.broadcast %59 : vector<1x1x1x128xf32> to vector<2x8x8x128xf32>
    %61 = arith.mulf %56, %60 : vector<2x8x8x128xf32>
    %62 = arith.addf %55, %61 : vector<2x8x8x128xf32>
    %c0_34 = arith.constant 0 : index
    %c1_35 = arith.constant 1 : index
    %c4_36 = arith.constant 4 : index
    %c0_37 = arith.constant 0 : index
    %63 = vector.load %arg1[%c0_34, %c1_35, %c4_36, %c0_37] : memref<2x12x12x128xf32, #tpu.memory_space<vmem>>, vector<2x8x8x128xf32>
    %64 = vector.extract_strided_slice %0 {offsets = [1, 4, 0], sizes = [1, 1, 128], strides = [1, 1, 1]} : vector<5x5x128xf32> to vector<1x1x128xf32>
    %65 = vector.shape_cast %64 : vector<1x1x128xf32> to vector<128xf32>
    %66 = vector.shape_cast %65 : vector<128xf32> to vector<1x1x1x128xf32>
    %67 = vector.broadcast %66 : vector<1x1x1x128xf32> to vector<2x8x8x128xf32>
    %68 = arith.mulf %63, %67 : vector<2x8x8x128xf32>
    %69 = arith.addf %62, %68 : vector<2x8x8x128xf32>
    %c0_38 = arith.constant 0 : index
    %c2_39 = arith.constant 2 : index
    %c0_40 = arith.constant 0 : index
    %c0_41 = arith.constant 0 : index
    %70 = vector.load %arg1[%c0_38, %c2_39, %c0_40, %c0_41] : memref<2x12x12x128xf32, #tpu.memory_space<vmem>>, vector<2x8x8x128xf32>
    %71 = vector.extract_strided_slice %0 {offsets = [2, 0, 0], sizes = [1, 1, 128], strides = [1, 1, 1]} : vector<5x5x128xf32> to vector<1x1x128xf32>
    %72 = vector.shape_cast %71 : vector<1x1x128xf32> to vector<128xf32>
    %73 = vector.shape_cast %72 : vector<128xf32> to vector<1x1x1x128xf32>
    %74 = vector.broadcast %73 : vector<1x1x1x128xf32> to vector<2x8x8x128xf32>
    %75 = arith.mulf %70, %74 : vector<2x8x8x128xf32>
    %76 = arith.addf %69, %75 : vector<2x8x8x128xf32>
    %c0_42 = arith.constant 0 : index
    %c2_43 = arith.constant 2 : index
    %c1_44 = arith.constant 1 : index
    %c0_45 = arith.constant 0 : index
    %77 = vector.load %arg1[%c0_42, %c2_43, %c1_44, %c0_45] : memref<2x12x12x128xf32, #tpu.memory_space<vmem>>, vector<2x8x8x128xf32>
    %78 = vector.extract_strided_slice %0 {offsets = [2, 1, 0], sizes = [1, 1, 128], strides = [1, 1, 1]} : vector<5x5x128xf32> to vector<1x1x128xf32>
    %79 = vector.shape_cast %78 : vector<1x1x128xf32> to vector<128xf32>
    %80 = vector.shape_cast %79 : vector<128xf32> to vector<1x1x1x128xf32>
    %81 = vector.broadcast %80 : vector<1x1x1x128xf32> to vector<2x8x8x128xf32>
    %82 = arith.mulf %77, %81 : vector<2x8x8x128xf32>
    %83 = arith.addf %76, %82 : vector<2x8x8x128xf32>
    %c0_46 = arith.constant 0 : index
    %c2_47 = arith.constant 2 : index
    %c2_48 = arith.constant 2 : index
    %c0_49 = arith.constant 0 : index
    %84 = vector.load %arg1[%c0_46, %c2_47, %c2_48, %c0_49] : memref<2x12x12x128xf32, #tpu.memory_space<vmem>>, vector<2x8x8x128xf32>
    %85 = vector.extract_strided_slice %0 {offsets = [2, 2, 0], sizes = [1, 1, 128], strides = [1, 1, 1]} : vector<5x5x128xf32> to vector<1x1x128xf32>
    %86 = vector.shape_cast %85 : vector<1x1x128xf32> to vector<128xf32>
    %87 = vector.shape_cast %86 : vector<128xf32> to vector<1x1x1x128xf32>
    %88 = vector.broadcast %87 : vector<1x1x1x128xf32> to vector<2x8x8x128xf32>
    %89 = arith.mulf %84, %88 : vector<2x8x8x128xf32>
    %90 = arith.addf %83, %89 : vector<2x8x8x128xf32>
    %c0_50 = arith.constant 0 : index
    %c2_51 = arith.constant 2 : index
    %c3_52 = arith.constant 3 : index
    %c0_53 = arith.constant 0 : index
    %91 = vector.load %arg1[%c0_50, %c2_51, %c3_52, %c0_53] : memref<2x12x12x128xf32, #tpu.memory_space<vmem>>, vector<2x8x8x128xf32>
    %92 = vector.extract_strided_slice %0 {offsets = [2, 3, 0], sizes = [1, 1, 128], strides = [1, 1, 1]} : vector<5x5x128xf32> to vector<1x1x128xf32>
    %93 = vector.shape_cast %92 : vector<1x1x128xf32> to vector<128xf32>
    %94 = vector.shape_cast %93 : vector<128xf32> to vector<1x1x1x128xf32>
    %95 = vector.broadcast %94 : vector<1x1x1x128xf32> to vector<2x8x8x128xf32>
    %96 = arith.mulf %91, %95 : vector<2x8x8x128xf32>
    %97 = arith.addf %90, %96 : vector<2x8x8x128xf32>
    %c0_54 = arith.constant 0 : index
    %c2_55 = arith.constant 2 : index
    %c4_56 = arith.constant 4 : index
    %c0_57 = arith.constant 0 : index
    %98 = vector.load %arg1[%c0_54, %c2_55, %c4_56, %c0_57] : memref<2x12x12x128xf32, #tpu.memory_space<vmem>>, vector<2x8x8x128xf32>
    %99 = vector.extract_strided_slice %0 {offsets = [2, 4, 0], sizes = [1, 1, 128], strides = [1, 1, 1]} : vector<5x5x128xf32> to vector<1x1x128xf32>
    %100 = vector.shape_cast %99 : vector<1x1x128xf32> to vector<128xf32>
    %101 = vector.shape_cast %100 : vector<128xf32> to vector<1x1x1x128xf32>
    %102 = vector.broadcast %101 : vector<1x1x1x128xf32> to vector<2x8x8x128xf32>
    %103 = arith.mulf %98, %102 : vector<2x8x8x128xf32>
    %104 = arith.addf %97, %103 : vector<2x8x8x128xf32>
    %c0_58 = arith.constant 0 : index
    %c3_59 = arith.constant 3 : index
    %c0_60 = arith.constant 0 : index
    %c0_61 = arith.constant 0 : index
    %105 = vector.load %arg1[%c0_58, %c3_59, %c0_60, %c0_61] : memref<2x12x12x128xf32, #tpu.memory_space<vmem>>, vector<2x8x8x128xf32>
    %106 = vector.extract_strided_slice %0 {offsets = [3, 0, 0], sizes = [1, 1, 128], strides = [1, 1, 1]} : vector<5x5x128xf32> to vector<1x1x128xf32>
    %107 = vector.shape_cast %106 : vector<1x1x128xf32> to vector<128xf32>
    %108 = vector.shape_cast %107 : vector<128xf32> to vector<1x1x1x128xf32>
    %109 = vector.broadcast %108 : vector<1x1x1x128xf32> to vector<2x8x8x128xf32>
    %110 = arith.mulf %105, %109 : vector<2x8x8x128xf32>
    %111 = arith.addf %104, %110 : vector<2x8x8x128xf32>
    %c0_62 = arith.constant 0 : index
    %c3_63 = arith.constant 3 : index
    %c1_64 = arith.constant 1 : index
    %c0_65 = arith.constant 0 : index
    %112 = vector.load %arg1[%c0_62, %c3_63, %c1_64, %c0_65] : memref<2x12x12x128xf32, #tpu.memory_space<vmem>>, vector<2x8x8x128xf32>
    %113 = vector.extract_strided_slice %0 {offsets = [3, 1, 0], sizes = [1, 1, 128], strides = [1, 1, 1]} : vector<5x5x128xf32> to vector<1x1x128xf32>
    %114 = vector.shape_cast %113 : vector<1x1x128xf32> to vector<128xf32>
    %115 = vector.shape_cast %114 : vector<128xf32> to vector<1x1x1x128xf32>
    %116 = vector.broadcast %115 : vector<1x1x1x128xf32> to vector<2x8x8x128xf32>
    %117 = arith.mulf %112, %116 : vector<2x8x8x128xf32>
    %118 = arith.addf %111, %117 : vector<2x8x8x128xf32>
    %c0_66 = arith.constant 0 : index
    %c3_67 = arith.constant 3 : index
    %c2_68 = arith.constant 2 : index
    %c0_69 = arith.constant 0 : index
    %119 = vector.load %arg1[%c0_66, %c3_67, %c2_68, %c0_69] : memref<2x12x12x128xf32, #tpu.memory_space<vmem>>, vector<2x8x8x128xf32>
    %120 = vector.extract_strided_slice %0 {offsets = [3, 2, 0], sizes = [1, 1, 128], strides = [1, 1, 1]} : vector<5x5x128xf32> to vector<1x1x128xf32>
    %121 = vector.shape_cast %120 : vector<1x1x128xf32> to vector<128xf32>
    %122 = vector.shape_cast %121 : vector<128xf32> to vector<1x1x1x128xf32>
    %123 = vector.broadcast %122 : vector<1x1x1x128xf32> to vector<2x8x8x128xf32>
    %124 = arith.mulf %119, %123 : vector<2x8x8x128xf32>
    %125 = arith.addf %118, %124 : vector<2x8x8x128xf32>
    %c0_70 = arith.constant 0 : index
    %c3_71 = arith.constant 3 : index
    %c3_72 = arith.constant 3 : index
    %c0_73 = arith.constant 0 : index
    %126 = vector.load %arg1[%c0_70, %c3_71, %c3_72, %c0_73] : memref<2x12x12x128xf32, #tpu.memory_space<vmem>>, vector<2x8x8x128xf32>
    %127 = vector.extract_strided_slice %0 {offsets = [3, 3, 0], sizes = [1, 1, 128], strides = [1, 1, 1]} : vector<5x5x128xf32> to vector<1x1x128xf32>
    %128 = vector.shape_cast %127 : vector<1x1x128xf32> to vector<128xf32>
    %129 = vector.shape_cast %128 : vector<128xf32> to vector<1x1x1x128xf32>
    %130 = vector.broadcast %129 : vector<1x1x1x128xf32> to vector<2x8x8x128xf32>
    %131 = arith.mulf %126, %130 : vector<2x8x8x128xf32>
    %132 = arith.addf %125, %131 : vector<2x8x8x128xf32>
    %c0_74 = arith.constant 0 : index
    %c3_75 = arith.constant 3 : index
    %c4_76 = arith.constant 4 : index
    %c0_77 = arith.constant 0 : index
    %133 = vector.load %arg1[%c0_74, %c3_75, %c4_76, %c0_77] : memref<2x12x12x128xf32, #tpu.memory_space<vmem>>, vector<2x8x8x128xf32>
    %134 = vector.extract_strided_slice %0 {offsets = [3, 4, 0], sizes = [1, 1, 128], strides = [1, 1, 1]} : vector<5x5x128xf32> to vector<1x1x128xf32>
    %135 = vector.shape_cast %134 : vector<1x1x128xf32> to vector<128xf32>
    %136 = vector.shape_cast %135 : vector<128xf32> to vector<1x1x1x128xf32>
    %137 = vector.broadcast %136 : vector<1x1x1x128xf32> to vector<2x8x8x128xf32>
    %138 = arith.mulf %133, %137 : vector<2x8x8x128xf32>
    %139 = arith.addf %132, %138 : vector<2x8x8x128xf32>
    %c0_78 = arith.constant 0 : index
    %c4_79 = arith.constant 4 : index
    %c0_80 = arith.constant 0 : index
    %c0_81 = arith.constant 0 : index
    %140 = vector.load %arg1[%c0_78, %c4_79, %c0_80, %c0_81] : memref<2x12x12x128xf32, #tpu.memory_space<vmem>>, vector<2x8x8x128xf32>
    %141 = vector.extract_strided_slice %0 {offsets = [4, 0, 0], sizes = [1, 1, 128], strides = [1, 1, 1]} : vector<5x5x128xf32> to vector<1x1x128xf32>
    %142 = vector.shape_cast %141 : vector<1x1x128xf32> to vector<128xf32>
    %143 = vector.shape_cast %142 : vector<128xf32> to vector<1x1x1x128xf32>
    %144 = vector.broadcast %143 : vector<1x1x1x128xf32> to vector<2x8x8x128xf32>
    %145 = arith.mulf %140, %144 : vector<2x8x8x128xf32>
    %146 = arith.addf %139, %145 : vector<2x8x8x128xf32>
    %c0_82 = arith.constant 0 : index
    %c4_83 = arith.constant 4 : index
    %c1_84 = arith.constant 1 : index
    %c0_85 = arith.constant 0 : index
    %147 = vector.load %arg1[%c0_82, %c4_83, %c1_84, %c0_85] : memref<2x12x12x128xf32, #tpu.memory_space<vmem>>, vector<2x8x8x128xf32>
    %148 = vector.extract_strided_slice %0 {offsets = [4, 1, 0], sizes = [1, 1, 128], strides = [1, 1, 1]} : vector<5x5x128xf32> to vector<1x1x128xf32>
    %149 = vector.shape_cast %148 : vector<1x1x128xf32> to vector<128xf32>
    %150 = vector.shape_cast %149 : vector<128xf32> to vector<1x1x1x128xf32>
    %151 = vector.broadcast %150 : vector<1x1x1x128xf32> to vector<2x8x8x128xf32>
    %152 = arith.mulf %147, %151 : vector<2x8x8x128xf32>
    %153 = arith.addf %146, %152 : vector<2x8x8x128xf32>
    %c0_86 = arith.constant 0 : index
    %c4_87 = arith.constant 4 : index
    %c2_88 = arith.constant 2 : index
    %c0_89 = arith.constant 0 : index
    %154 = vector.load %arg1[%c0_86, %c4_87, %c2_88, %c0_89] : memref<2x12x12x128xf32, #tpu.memory_space<vmem>>, vector<2x8x8x128xf32>
    %155 = vector.extract_strided_slice %0 {offsets = [4, 2, 0], sizes = [1, 1, 128], strides = [1, 1, 1]} : vector<5x5x128xf32> to vector<1x1x128xf32>
    %156 = vector.shape_cast %155 : vector<1x1x128xf32> to vector<128xf32>
    %157 = vector.shape_cast %156 : vector<128xf32> to vector<1x1x1x128xf32>
    %158 = vector.broadcast %157 : vector<1x1x1x128xf32> to vector<2x8x8x128xf32>
    %159 = arith.mulf %154, %158 : vector<2x8x8x128xf32>
    %160 = arith.addf %153, %159 : vector<2x8x8x128xf32>
    %c0_90 = arith.constant 0 : index
    %c4_91 = arith.constant 4 : index
    %c3_92 = arith.constant 3 : index
    %c0_93 = arith.constant 0 : index
    %161 = vector.load %arg1[%c0_90, %c4_91, %c3_92, %c0_93] : memref<2x12x12x128xf32, #tpu.memory_space<vmem>>, vector<2x8x8x128xf32>
    %162 = vector.extract_strided_slice %0 {offsets = [4, 3, 0], sizes = [1, 1, 128], strides = [1, 1, 1]} : vector<5x5x128xf32> to vector<1x1x128xf32>
    %163 = vector.shape_cast %162 : vector<1x1x128xf32> to vector<128xf32>
    %164 = vector.shape_cast %163 : vector<128xf32> to vector<1x1x1x128xf32>
    %165 = vector.broadcast %164 : vector<1x1x1x128xf32> to vector<2x8x8x128xf32>
    %166 = arith.mulf %161, %165 : vector<2x8x8x128xf32>
    %167 = arith.addf %160, %166 : vector<2x8x8x128xf32>
    %c0_94 = arith.constant 0 : index
    %c4_95 = arith.constant 4 : index
    %c4_96 = arith.constant 4 : index
    %c0_97 = arith.constant 0 : index
    %168 = vector.load %arg1[%c0_94, %c4_95, %c4_96, %c0_97] : memref<2x12x12x128xf32, #tpu.memory_space<vmem>>, vector<2x8x8x128xf32>
    %169 = vector.extract_strided_slice %0 {offsets = [4, 4, 0], sizes = [1, 1, 128], strides = [1, 1, 1]} : vector<5x5x128xf32> to vector<1x1x128xf32>
    %170 = vector.shape_cast %169 : vector<1x1x128xf32> to vector<128xf32>
    %171 = vector.shape_cast %170 : vector<128xf32> to vector<1x1x1x128xf32>
    %172 = vector.broadcast %171 : vector<1x1x1x128xf32> to vector<2x8x8x128xf32>
    %173 = arith.mulf %168, %172 : vector<2x8x8x128xf32>
    %174 = arith.addf %167, %173 : vector<2x8x8x128xf32>
    %cst = arith.constant dense<0.000000e+00> : vector<8x8x128xf32>
    %175 = vector.multi_reduction <add>, %174, %cst [0] : vector<2x8x8x128xf32> to vector<8x8x128xf32>
    %176 = vector.shape_cast %175 : vector<8x8x128xf32> to vector<1x8x8x128xf32>
    %cst_98 = arith.constant dense<0.000000e+00> : vector<1x8x128xf32>
    %177 = vector.multi_reduction <add>, %176, %cst_98 [1] : vector<1x8x8x128xf32> to vector<1x8x128xf32>
    %178 = vector.shape_cast %177 : vector<1x8x128xf32> to vector<1x1x8x128xf32>
    %cst_99 = arith.constant dense<0.000000e+00> : vector<1x1x128xf32>
    %179 = vector.multi_reduction <add>, %178, %cst_99 [2] : vector<1x1x8x128xf32> to vector<1x1x128xf32>
    %180 = vector.shape_cast %179 : vector<1x1x128xf32> to vector<1x1x1x128xf32>
    %cst_100 = arith.constant 7.812500e-03 : f32
    %181 = vector.broadcast %cst_100 : f32 to vector<1x1x1x128xf32>
    %182 = arith.mulf %180, %181 : vector<1x1x1x128xf32>
    %183 = vector.broadcast %182 : vector<1x1x1x128xf32> to vector<2x8x8x128xf32>
    %184 = arith.subf %174, %183 : vector<2x8x8x128xf32>
    %185 = arith.mulf %184, %184 : vector<2x8x8x128xf32>
    %cst_101 = arith.constant dense<0.000000e+00> : vector<8x8x128xf32>
    %186 = vector.multi_reduction <add>, %185, %cst_101 [0] : vector<2x8x8x128xf32> to vector<8x8x128xf32>
    %187 = vector.shape_cast %186 : vector<8x8x128xf32> to vector<1x8x8x128xf32>
    %cst_102 = arith.constant dense<0.000000e+00> : vector<1x8x128xf32>
    %188 = vector.multi_reduction <add>, %187, %cst_102 [1] : vector<1x8x8x128xf32> to vector<1x8x128xf32>
    %189 = vector.shape_cast %188 : vector<1x8x128xf32> to vector<1x1x8x128xf32>
    %cst_103 = arith.constant dense<0.000000e+00> : vector<1x1x128xf32>
    %190 = vector.multi_reduction <add>, %189, %cst_103 [2] : vector<1x1x8x128xf32> to vector<1x1x128xf32>
    %191 = vector.shape_cast %190 : vector<1x1x128xf32> to vector<1x1x1x128xf32>
    %cst_104 = arith.constant 7.812500e-03 : f32
    %192 = vector.broadcast %cst_104 : f32 to vector<1x1x1x128xf32>
    %193 = arith.mulf %191, %192 : vector<1x1x1x128xf32>
    %c0_105 = arith.constant 0 : index
    %c0_106 = arith.constant 0 : index
    %194 = vector.load %arg3[%c0_105, %c0_106] : memref<1x128xf32, #tpu.memory_space<vmem>>, vector<1x128xf32>
    %195 = vector.shape_cast %194 : vector<1x128xf32> to vector<1x1x1x128xf32>
    %c0_107 = arith.constant 0 : index
    %c0_108 = arith.constant 0 : index
    %196 = vector.load %arg4[%c0_107, %c0_108] : memref<1x128xf32, #tpu.memory_space<vmem>>, vector<1x128xf32>
    %197 = vector.shape_cast %196 : vector<1x128xf32> to vector<1x1x1x128xf32>
    %cst_109 = arith.constant 9.99999974E-6 : f32
    %198 = vector.broadcast %cst_109 : f32 to vector<1x1x1x128xf32>
    %199 = arith.addf %193, %198 : vector<1x1x1x128xf32>
    %200 = math.rsqrt %199 : vector<1x1x1x128xf32>
    %201 = arith.mulf %195, %200 : vector<1x1x1x128xf32>
    %202 = vector.broadcast %201 : vector<1x1x1x128xf32> to vector<2x8x8x128xf32>
    %203 = arith.mulf %184, %202 : vector<2x8x8x128xf32>
    %204 = vector.broadcast %197 : vector<1x1x1x128xf32> to vector<2x8x8x128xf32>
    %205 = arith.addf %203, %204 : vector<2x8x8x128xf32>
    %c0_110 = arith.constant 0 : index
    %c0_111 = arith.constant 0 : index
    %c0_112 = arith.constant 0 : index
    %c0_113 = arith.constant 0 : index
    %206 = vector.load %arg5[%c0_110, %c0_111, %c0_112, %c0_113] : memref<2x8x8x128xf32, #tpu.memory_space<vmem>>, vector<2x8x8x128xf32>
    tpu.vector_store %arg5[%c0_110, %c0_111, %c0_112, %c0_113], %205 {strides = array<i32>} : memref<2x8x8x128xf32, #tpu.memory_space<vmem>>, vector<2x8x8x128xf32>,
    return
  }
  func.func @transform_0(%arg0: i32) -> (i32, i32, i32, i32) {
    %c0_i32 = arith.constant 0 : i32
    %c0_i32_0 = arith.constant 0 : i32
    %c0_i32_1 = arith.constant 0 : i32
    %c0_i32_2 = arith.constant 0 : i32
    return %c0_i32, %c0_i32_0, %c0_i32_1, %arg0 : i32, i32, i32, i32
  }
  func.func @transform_1(%arg0: i32) -> (i32, i32, i32) {
    %c0_i32 = arith.constant 0 : i32
    %c0_i32_0 = arith.constant 0 : i32
    %c0_i32_1 = arith.constant 0 : i32
    return %c0_i32, %c0_i32_0, %arg0 : i32, i32, i32
  }
  func.func @transform_2(%arg0: i32) -> (i32, i32) {
    %c0_i32 = arith.constant 0 : i32
    %c0_i32_0 = arith.constant 0 : i32
    return %c0_i32, %arg0 : i32, i32
  }
  func.func @transform_3(%arg0: i32) -> (i32, i32) {
    %c0_i32 = arith.constant 0 : i32
    %c0_i32_0 = arith.constant 0 : i32
    return %c0_i32, %arg0 : i32, i32
  }
  func.func @transform_4(%arg0: i32) -> (i32, i32, i32, i32) {
    %c0_i32 = arith.constant 0 : i32
    %c0_i32_0 = arith.constant 0 : i32
    %c0_i32_1 = arith.constant 0 : i32
    %c0_i32_2 = arith.constant 0 : i32
    return %c0_i32, %c0_i32_0, %c0_i32_1, %arg0 : i32, i32, i32, i32
  }
}

</mosaic_0001>

<bundles_post_ra>
// kernel: depthwise_conv_bn.1
= control target key start
LH: loop header
LB: loop body
LE: loop exit
PB: predicated region body
PF: predicated region fallthrough
CT: control target
= control target key end

     0   :  { %s2554_s15 = smov 0   ;;  %s2556_s16 = smov 0   ;;  %s4017_s0 = inlined_call_operand.vmem [shape: f32[2,12,12,256], index: 0, kind: input, shape index: {}]   ;;  %s4018_s1 = inlined_call_operand.vmem [shape: f32[5,5,256], index: 1, kind: input, shape index: {}]   ;;  %s4019_s2 = inlined_call_operand.vmem [shape: f32[1,256], index: 2, kind: input, shape index: {}]   ;;  %s4020_s3 = inlined_call_operand.vmem [shape: f32[1,256], index: 3, kind: input, shape index: {}]   ;;  %s4021_s4 = inlined_call_operand.vmem [shape: f32[2,8,8,256], index: 4, kind: output, shape index: {}]  }
   0x1   :  { %s2558_s17 = smov 0  }
   0x2 LB: > { %s2570_s18 = sadd.s32 4294967295, %s2527_s17   ;;  %s2573_s19 = sadd.s32 1, %s2527_s17   ;;  %s2527_s17 = sphi %s2558_s17, %s4550_s17   ;;  %s2523_s16 = sphi %s2556_s16, %s4549_s16   ;;  %s2519_s15 = sphi %s2554_s15, %s4548_s15  }
   0x3   : > { %s18_s20 = ssub.s32 %s2527_s17, %s2573_s19  ;;  %s21_s21 = sadd.s32 1, %s2523_s16 }
   0x4   : > { %p19_p0 = scmp.eq.s32.totalorder %s18_s20, 0  ;;  %p28_p1 = scmp.ne.s32.totalorder %s2523_s16, %s2519_s15 }
   0x5   : > { %p29_p2 = scmp.eq.s32.totalorder %s2527_s17, 0  ;;  %p136_p3 = scmp.eq.s32.totalorder %s2570_s18, 1 }
   0x6   : > { %s2583_s22 = scalar_select %p19_p0, %s2523_s16, %s21_s21  }
   0x7   : > { %p2585_p4 = por %p29_p2, %p28_p1  ;;  %p2589_p5 = por %p136_p3, %p28_p1 }
   0x8   : > { %p2145_p6 = scmp.ge.s32.totalorder %s2527_s17, 2 }
   0xa   : > { %158 = sbr.rel (%p2145_p6) target bundleno = 50 (0x32), region = 16 }
   0xf   : > { %161 = sbr.rel (!%p2585_p4) target bundleno = 43 (0x2b), region = 20  ;;  %s163_s25 = sand.u32 (%p2585_p4), 1, %s2523_s16  }
  0x10   : > { %s2146_s26 = sshll.u32 (%p2585_p4), %s2527_s17, 3  ;;  %s2475_s27 = smul.u32 (%p2585_p4), 384, %s163_s25 }
  0x11   : > { %s2601_s30 = scalar_lea.vmem (%p2585_p4), %s4017_s0, %s2146_s26 }
  0x12   : > { %v290_v0 = vld [vmem:[%s2601_s30] sm:$0xff] (%p2585_p4)  ;;  %v292_v1 = vld [vmem:[%s2601_s30 + $0x10] sm:$0xff] (%p2585_p4)  ;;  %s2609_s5 = scalar_lea.vmem (%p2585_p4), [#allocation2], %s2475_s27 }
  0x13   : > { %v294_v2 = vld [vmem:[%s2601_s30 + $0x20] sm:$0xff] (%p2585_p4)  ;;  %v296_v3 = vld [vmem:[%s2601_s30 + $0x30] sm:$0xff] (%p2585_p4)  ;;  %291 = vst [vmem:[%s2609_s5] sm:$0xff] (%p2585_p4), %v290_v0  ;;  %293 = vst [vmem:[%s2609_s5 + $0x8] sm:$0xff] (%p2585_p4), %v292_v1 }
  0x14   : > { %v298_v4 = vld [vmem:[%s2601_s30 + $0x40] sm:$0xff]  ;;  %v300_v5 = vld [vmem:[%s2601_s30 + $0x50] sm:$0xff]  ;;  %295 = vst [vmem:[%s2609_s5 + $0x10] sm:$0xff] %v294_v2  ;;  %297 = vst [vmem:[%s2609_s5 + $0x18] sm:$0xff] %v296_v3 }
  0x15   : > { %299 = vst [vmem:[%s2609_s5 + $0x20] sm:$0xff] %v298_v4  ;;  %301 = vst [vmem:[%s2609_s5 + $0x28] sm:$0xff] %v300_v5  ;;  %v302_v6 = vld [vmem:[%s2601_s30 + $0x60] sm:$0xff]  ;;  %v304_v7 = vld [vmem:[%s2601_s30 + $0x70] sm:$0xff] }
  0x16   : > { %v306_v8 = vld [vmem:[%s2601_s30 + $0x80] sm:$0xff]  ;;  %303 = vst [vmem:[%s2609_s5 + $0x30] sm:$0xff] %v302_v6  ;;  %305 = vst [vmem:[%s2609_s5 + $0x38] sm:$0xff] %v304_v7  ;;  %v308_v9 = vld [vmem:[%s2601_s30 + $0x90] sm:$0xff] }
  0x17   : > { %307 = vst [vmem:[%s2609_s5 + $0x40] sm:$0xff] %v306_v8  ;;  %v310_v10 = vld [vmem:[%s2601_s30 + $0xa0] sm:$0xff]  ;;  %v312_v11 = vld [vmem:[%s2601_s30 + $0xb0] sm:$0xff]  ;;  %309 = vst [vmem:[%s2609_s5 + $0x48] sm:$0xff] %v308_v9 }
  0x18   : > { %311 = vst [vmem:[%s2609_s5 + $0x50] sm:$0xff] %v310_v10  ;;  %313 = vst [vmem:[%s2609_s5 + $0x58] sm:$0xff] %v312_v11  ;;  %v314_v12 = vld [vmem:[%s2601_s30 + $0xc0] sm:$0xff]  ;;  %v316_v13 = vld [vmem:[%s2601_s30 + $0xd0] sm:$0xff] }
  0x19   : > { %v318_v14 = vld [vmem:[%s2601_s30 + $0xe0] sm:$0xff]  ;;  %315 = vst [vmem:[%s2609_s5 + $0x60] sm:$0xff] %v314_v12  ;;  %317 = vst [vmem:[%s2609_s5 + $0x68] sm:$0xff] %v316_v13  ;;  %v320_v15 = vld [vmem:[%s2601_s30 + $0xf0] sm:$0xff] }
  0x1a   : > { %319 = vst [vmem:[%s2609_s5 + $0x70] sm:$0xff] %v318_v14  ;;  %v322_v16 = vld [vmem:[%s2601_s30 + $0x100] sm:$0xff]  ;;  %v324_v17 = vld [vmem:[%s2601_s30 + $0x110] sm:$0xff]  ;;  %321 = vst [vmem:[%s2609_s5 + $0x78] sm:$0xff] %v320_v15 }
  0x1b   : > { %323 = vst [vmem:[%s2609_s5 + $0x80] sm:$0xff] %v322_v16  ;;  %325 = vst [vmem:[%s2609_s5 + $0x88] sm:$0xff] %v324_v17  ;;  %v326_v18 = vld [vmem:[%s2601_s30 + $0x120] sm:$0xff]  ;;  %v328_v19 = vld [vmem:[%s2601_s30 + $0x130] sm:$0xff] }
  0x1c   : > { %v330_v20 = vld [vmem:[%s2601_s30 + $0x140] sm:$0xff]  ;;  %327 = vst [vmem:[%s2609_s5 + $0x90] sm:$0xff] %v326_v18  ;;  %329 = vst [vmem:[%s2609_s5 + $0x98] sm:$0xff] %v328_v19  ;;  %v332_v21 = vld [vmem:[%s2601_s30 + $0x150] sm:$0xff] }
  0x1d   : > { %331 = vst [vmem:[%s2609_s5 + $0xa0] sm:$0xff] %v330_v20  ;;  %v334_v22 = vld [vmem:[%s2601_s30 + $0x160] sm:$0xff]  ;;  %v336_v23 = vld [vmem:[%s2601_s30 + $0x170] sm:$0xff]  ;;  %333 = vst [vmem:[%s2609_s5 + $0xa8] sm:$0xff] %v332_v21 }
  0x1e   : > { %335 = vst [vmem:[%s2609_s5 + $0xb0] sm:$0xff] %v334_v22  ;;  %337 = vst [vmem:[%s2609_s5 + $0xb8] sm:$0xff] %v336_v23  ;;  %v338_v24 = vld [vmem:[%s2601_s30 + $0x180] sm:$0xff]  ;;  %v340_v25 = vld [vmem:[%s2601_s30 + $0x190] sm:$0xff] }
  0x1f   : > { %v342_v26 = vld [vmem:[%s2601_s30 + $0x1a0] sm:$0xff]  ;;  %339 = vst [vmem:[%s2609_s5 + $0xc0] sm:$0xff] %v338_v24  ;;  %341 = vst [vmem:[%s2609_s5 + $0xc8] sm:$0xff] %v340_v25  ;;  %v344_v27 = vld [vmem:[%s2601_s30 + $0x1b0] sm:$0xff] }
  0x20   : > { %343 = vst [vmem:[%s2609_s5 + $0xd0] sm:$0xff] %v342_v26  ;;  %v346_v28 = vld [vmem:[%s2601_s30 + $0x1c0] sm:$0xff]  ;;  %v348_v29 = vld [vmem:[%s2601_s30 + $0x1d0] sm:$0xff]  ;;  %345 = vst [vmem:[%s2609_s5 + $0xd8] sm:$0xff] %v344_v27 }
  0x21   : > { %347 = vst [vmem:[%s2609_s5 + $0xe0] sm:$0xff] %v346_v28  ;;  %349 = vst [vmem:[%s2609_s5 + $0xe8] sm:$0xff] %v348_v29  ;;  %v350_v30 = vld [vmem:[%s2601_s30 + $0x1e0] sm:$0xff]  ;;  %v352_v31 = vld [vmem:[%s2601_s30 + $0x1f0] sm:$0xff] }
  0x22   : > { %v354_v32 = vld [vmem:[%s2601_s30 + $0x200] sm:$0xff]  ;;  %351 = vst [vmem:[%s2609_s5 + $0xf0] sm:$0xff] %v350_v30  ;;  %353 = vst [vmem:[%s2609_s5 + $0xf8] sm:$0xff] %v352_v31  ;;  %v356_v33 = vld [vmem:[%s2601_s30 + $0x210] sm:$0xff] }
  0x23   : > { %355 = vst [vmem:[%s2609_s5 + $0x100] sm:$0xff] %v354_v32  ;;  %v358_v34 = vld [vmem:[%s2601_s30 + $0x220] sm:$0xff]  ;;  %v360_v35 = vld [vmem:[%s2601_s30 + $0x230] sm:$0xff]  ;;  %357 = vst [vmem:[%s2609_s5 + $0x108] sm:$0xff] %v356_v33 }
  0x24   : > { %359 = vst [vmem:[%s2609_s5 + $0x110] sm:$0xff] %v358_v34  ;;  %361 = vst [vmem:[%s2609_s5 + $0x118] sm:$0xff] %v360_v35  ;;  %v362_v36 = vld [vmem:[%s2601_s30 + $0x240] sm:$0xff]  ;;  %v364_v37 = vld [vmem:[%s2601_s30 + $0x250] sm:$0xff] }
  0x25   : > { %v366_v38 = vld [vmem:[%s2601_s30 + $0x260] sm:$0xff]  ;;  %363 = vst [vmem:[%s2609_s5 + $0x120] sm:$0xff] %v362_v36  ;;  %365 = vst [vmem:[%s2609_s5 + $0x128] sm:$0xff] %v364_v37  ;;  %v368_v39 = vld [vmem:[%s2601_s30 + $0x270] sm:$0xff] }
  0x26   : > { %367 = vst [vmem:[%s2609_s5 + $0x130] sm:$0xff] %v366_v38  ;;  %v370_v40 = vld [vmem:[%s2601_s30 + $0x280] sm:$0xff]  ;;  %v372_v41 = vld [vmem:[%s2601_s30 + $0x290] sm:$0xff]  ;;  %369 = vst [vmem:[%s2609_s5 + $0x138] sm:$0xff] %v368_v39 }
  0x27   : > { %371 = vst [vmem:[%s2609_s5 + $0x140] sm:$0xff] %v370_v40  ;;  %373 = vst [vmem:[%s2609_s5 + $0x148] sm:$0xff] %v372_v41  ;;  %v374_v42 = vld [vmem:[%s2601_s30 + $0x2a0] sm:$0xff]  ;;  %v376_v43 = vld [vmem:[%s2601_s30 + $0x2b0] sm:$0xff] }
  0x28   : > { %v378_v44 = vld [vmem:[%s2601_s30 + $0x2c0] sm:$0xff]  ;;  %375 = vst [vmem:[%s2609_s5 + $0x150] sm:$0xff] %v374_v42  ;;  %377 = vst [vmem:[%s2609_s5 + $0x158] sm:$0xff] %v376_v43  ;;  %v380_v45 = vld [vmem:[%s2601_s30 + $0x2d0] sm:$0xff] }
  0x29   : > { %379 = vst [vmem:[%s2609_s5 + $0x160] sm:$0xff] %v378_v44  ;;  %v382_v46 = vld [vmem:[%s2601_s30 + $0x2e0] sm:$0xff]  ;;  %v384_v47 = vld [vmem:[%s2601_s30 + $0x2f0] sm:$0xff]  ;;  %381 = vst [vmem:[%s2609_s5 + $0x168] sm:$0xff] %v380_v45 }
  0x2a   : > { %383 = vst [vmem:[%s2609_s5 + $0x170] sm:$0xff] %v382_v46  ;;  %385 = vst [vmem:[%s2609_s5 + $0x178] sm:$0xff] %v384_v47 }
  0x2b PF: > { %391 = sbr.rel (!%p2585_p4) target bundleno = 50 (0x32), region = 58  ;;  %s393_s6 = sand.u32 (%p2585_p4), 1, %s2523_s16  }
  0x2c   : > { %s2147_s7 = sshll.u32 (%p2585_p4), %s2527_s17, 3  ;;  %s2476_s8 = smul.u32 (%p2585_p4), 40, %s393_s6 }
  0x2d   : > { %s397_s11 = scalar_lea.vmem (%p2585_p4), %s4018_s1, %s2147_s7 }
  0x2e   : > { %v434_v48 = vld [vmem:[%s397_s11] sm:$0xff] (%p2585_p4)  ;;  %v436_v49 = vld [vmem:[%s397_s11 + $0x10] sm:$0xff] (%p2585_p4)  ;;  %s395_s12 = scalar_lea.vmem (%p2585_p4), [#allocation3], %s2476_s8 }
  0x2f   : > { %v438_v50 = vld [vmem:[%s397_s11 + $0x20] sm:$0xff] (%p2585_p4)  ;;  %v440_v51 = vld [vmem:[%s397_s11 + $0x30] sm:$0xff] (%p2585_p4)  ;;  %435 = vst [vmem:[%s395_s12] sm:$0xff] (%p2585_p4), %v434_v48  ;;  %437 = vst [vmem:[%s395_s12 + $0x8] sm:$0xff] (%p2585_p4), %v436_v49 }
  0x30   : > { %v442_v52 = vld [vmem:[%s397_s11 + $0x40] sm:$0xff]  ;;  %439 = vst [vmem:[%s395_s12 + $0x10] sm:$0xff] %v438_v50  ;;  %441 = vst [vmem:[%s395_s12 + $0x18] sm:$0xff] %v440_v51 }
  0x31   : > { %443 = vst [vmem:[%s395_s12 + $0x20] sm:$0xff] %v442_v52 }
  0x32 PF: > { %p2148_p7 = scmp.ge.s32.totalorder %s2527_s17, 1  ;;  %p460_p8 = scmp.lt.s32.totalorder %s2527_s17, 3 }
  0x34   : > { %p461_p9 = pnand %p2148_p7, %p460_p8 }
  0x36   : > { %464 = sbr.rel (%p461_p9) target bundleno = 385 (0x181), region = 104 }
  0x3b   : > { %s2711_s13 = sand.u32 1, %s2519_s15   ;;  %v535_v53 = vlaneseq  ;;  %p508_p10 = scmp.lt.s32.totalorder %s2570_s18, 1 }
  0x3c   : > { %s2477_s14 = smul.u32 384, %s2711_s13  ;;  %s2149_s30 = sshll.u32 %s2711_s13, 7 }
  0x3d   : > { %s2478_s20 = smul.u32 40, %s2711_s13  ;;  %v536_v54 = vshrl.u32 %v535_v53, 7  ;;  %s3967_s5 = scalar_lea.vmem [#allocation4], %s2149_s30 }
  0x3e   : > { %s2722_s17 = scalar_lea.vmem [#allocation2], %s2477_s14  ;;  %s2472_s6 = sshll.u32 (%p2589_p5), %s2570_s18, 3 }
  0x3f   : > { %v2715_v55 = vsub.s32 0, %v536_v54  ;;  %s2717_s21 = scalar_lea.vmem [#allocation3], %s2478_s20  ;;  %v519_v57 = vld [vmem:[%s2722_s17] sm:$0xff]  ;;  %v2725_v58 = vsub.s32 1, %v536_v54  ;;  %v2734_v61 = vld [vmem:[%s2722_s17 + $0x10] sm:$0xff]  ;;  %v2771_v11 = vsub.s32 2, %v536_v54  ;;  %s1956_s9 = scalar_lea.vmem (%p2589_p5), %s4021_s4, %s2472_s6 }
  0x40   : > { %v2720_v56 = vld [vmem:[%s2717_s21] sm:$0x1f]  ;;  %v2728_v59 = vld [vmem:[%s2717_s21 + $0x8] sm:$0x1f]  ;;  %v2731_v60 = vld [vmem:[%s2717_s21 + $0x10] sm:$0x1f] }
  0x41   : > { %4222 = vst [vmem:[#allocation5_spill] sm:$0xff] %v2715_v55  ;;  %4223 = vst [vmem:[#allocation6_spill] sm:$0xff] %v2725_v58  ;;  %v2737_v62 = vld [vmem:[%s2722_s17 + $0x20] sm:$0xff]  ;;  %v2740_v63 = vld [vmem:[%s2722_s17 + $0x30] sm:$0xff]  ;;  %v538_v0 = vrot.slane %v2720_v56, %v2715_v55  ;;  %v574_v10 = vrot.slane %v2720_v56, %v2725_v58  ;;  %v2775_v12 = vrot.slane %v2728_v59, %v2715_v55  ;;  %v2790_v18 = vsub.s32 3, %v536_v54  ;;  %s509_s15 = scalar_select %p508_p10, %s2570_s18, 1 }
  0x42   : > { %4224 = vst [vmem:[#allocation7_spill] sm:$0xff] %v2728_v59  ;;  %4225 = vst [vmem:[#allocation8_spill] sm:$0xff] %v2731_v60  ;;  %v2745_v1 = vld [vmem:[%s2722_s17 + $0x40] sm:$0xff]  ;;  %v2748_v2 = vld [vmem:[%s2722_s17 + $0x50] sm:$0xff]  ;;  %v2779_v13 = vrot.slane %v2728_v59, %v2725_v58  ;;  %v2792_v19 = vsub.s32 4, %v536_v54  ;;  %v2796_v20 = vrot.slane %v2731_v60, %v2715_v55 }
  0x43   : > { %4226 = vst [vmem:[#allocation9_spill] sm:$0xff] %v2737_v62  ;;  %4227 = vst [vmem:[#allocation10_spill] sm:$0xff] %v2740_v63  ;;  %v2751_v3 = vld [vmem:[%s2722_s17 + $0x60] sm:$0xff]  ;;  %v2754_v4 = vld [vmem:[%s2722_s17 + $0x70] sm:$0xff]  ;;  %v539_v17 = vmul.f32 %v538_v0, %v519_v57  ;;  %v540_v21 = vmul.f32 %v538_v0, %v2734_v61  ;;  %v541_v22 = vmul.f32 %v538_v0, %v2737_v62  ;;  %s510_s26 = scalar_lea.vmem %s4019_s2, %s509_s15  ;;  %s513_s29 = scalar_lea.vmem %s4020_s3, %s509_s15 }
  0x44   : > { %4228 = vst [vmem:[#allocation11_spill] sm:$0xff] %v2745_v1  ;;  %4229 = vst [vmem:[#allocation12_spill] sm:$0xff] %v2748_v2  ;;  %v527_v5 = vld [vmem:[%s2722_s17 + $0xc0] sm:$0xff]  ;;  %v2758_v6 = vld [vmem:[%s2722_s17 + $0xd0] sm:$0xff]  ;;  %v542_v23 = vmul.f32 %v538_v0, %v2740_v63  ;;  %v543_v24 = vmul.f32 %v538_v0, %v2745_v1  ;;  %v544_v28 = vmul.f32 %v538_v0, %v2748_v2 }
  0x45   : > { %v2761_v7 = vld [vmem:[%s2722_s17 + $0xe0] sm:$0xff]  ;;  %v2764_v8 = vld [vmem:[%s2722_s17 + $0xf0] sm:$0xff]  ;;  %4230 = vst [vmem:[#allocation13_spill] sm:$0xff] %v2771_v11  ;;  %4231 = vst [vmem:[#allocation14_spill] sm:$0xff] %v2779_v13  ;;  %v545_v29 = vmul.f32 %v538_v0, %v2751_v3  ;;  %v546_v30 = vmul.f32 %v538_v0, %v2754_v4  ;;  %v547_v31 = vmul.f32 %v538_v0, %v527_v5 }
  0x46   : > { %v2767_v9 = vld [vmem:[%s2722_s17 + $0x100] sm:$0xff]  ;;  %v2782_v14 = vld [vmem:[%s2722_s17 + $0x110] sm:$0xff]  ;;  %4234 = vst [vmem:[#allocation17_spill] sm:$0xff] %v2790_v18  ;;  %4235 = vst [vmem:[#allocation18_spill] sm:$0xff] %v2792_v19  ;;  %v548_v35 = vmul.f32 %v538_v0, %v2758_v6  ;;  %v549_v36 = vmul.f32 %v538_v0, %v2761_v7  ;;  %v550_v37 = vmul.f32 %v538_v0, %v2764_v8 }
  0x47   : > { %v2785_v15 = vld [vmem:[%s2722_s17 + $0x120] sm:$0xff]  ;;  %v2788_v16 = vld [vmem:[%s2722_s17 + $0x130] sm:$0xff]  ;;  %4236 = vst [vmem:[#allocation19_spill] sm:$0xff] %v2796_v20  ;;  %v551_v38 = vmul.f32 %v538_v0, %v2767_v9  ;;  %v552_v42 = vmul.f32 %v538_v0, %v2782_v14  ;;  %v626_v57 = vrot.slane %v2720_v56, %v2771_v11  ;;  %v2866_v60 = vrot.slane %v2720_v56, %v2790_v18 }
  0x48   : > { %4232 = vst [vmem:[#allocation15_spill] sm:$0xff] %v2785_v15  ;;  %4233 = vst [vmem:[#allocation16_spill] sm:$0xff] %v2788_v16  ;;  %v555_v25 = vld [vmem:[%s2722_s17 + $0x1] sm:$0xff]  ;;  %v2804_v26 = vld [vmem:[%s2722_s17 + $0x11] sm:$0xff]  ;;  %v553_v43 = vmul.f32 %v538_v0, %v2785_v15  ;;  %v554_v44 = vmul.f32 %v538_v0, %v2788_v16 }
  0x49   : > { %4237 = vst [vmem:[#allocation20_spill] sm:$0xff] %v2804_v26  ;;  %v2807_v27 = vld [vmem:[%s2722_s17 + $0x21] sm:$0xff]  ;;  %v2813_v32 = vld [vmem:[%s2722_s17 + $0x31] sm:$0xff]  ;;  %v575_v48 = vmul.f32 %v574_v10, %v555_v25  ;;  %v576_v52 = vmul.f32 %v574_v10, %v2804_v26 }
  0x4a   : > { %4238 = vst [vmem:[#allocation21_spill] sm:$0xff] %v2807_v27  ;;  %4239 = vst [vmem:[#allocation22_spill] sm:$0xff] %v2813_v32  ;;  %v2816_v33 = vld [vmem:[%s2722_s17 + $0x41] sm:$0xff]  ;;  %v2819_v34 = vld [vmem:[%s2722_s17 + $0x51] sm:$0xff]  ;;  %v577_v53 = vmul.f32 %v574_v10, %v2807_v27  ;;  %v578_v54 = vmul.f32 %v574_v10, %v2813_v32 }
  0x4b   : > { %4240 = vst [vmem:[#allocation23_spill] sm:$0xff] %v2816_v33  ;;  %4241 = vst [vmem:[#allocation24_spill] sm:$0xff] %v2819_v34  ;;  %v2826_v39 = vld [vmem:[%s2722_s17 + $0x61] sm:$0xff]  ;;  %v2829_v40 = vld [vmem:[%s2722_s17 + $0x71] sm:$0xff]  ;;  %v579_v5 = vmul.f32 %v574_v10, %v2816_v33  ;;  %v580_v25 = vmul.f32 %v574_v10, %v2819_v34  ;;  %v591_v27 = vadd.f32 %v575_v48, %v539_v17 }
  0x4c   : > { %4242 = vst [vmem:[#allocation25_spill] sm:$0xff] %v2826_v39  ;;  %4243 = vst [vmem:[#allocation26_spill] sm:$0xff] %v2829_v40  ;;  %v563_v41 = vld [vmem:[%s2722_s17 + $0xc1] sm:$0xff]  ;;  %v2836_v45 = vld [vmem:[%s2722_s17 + $0xd1] sm:$0xff]  ;;  %v581_v55 = vmul.f32 %v574_v10, %v2826_v39  ;;  %v582_v58 = vmul.f32 %v574_v10, %v2829_v40  ;;  %v592_v40 = vadd.f32 %v576_v52, %v540_v21 }
  0x4d   : > { %4244 = vst [vmem:[#allocation27_spill] sm:$0xff] %v2836_v45  ;;  %v2839_v46 = vld [vmem:[%s2722_s17 + $0xe1] sm:$0xff]  ;;  %v2842_v47 = vld [vmem:[%s2722_s17 + $0xf1] sm:$0xff]  ;;  %v583_v20 = vmul.f32 %v574_v10, %v563_v41  ;;  %v584_v59 = vmul.f32 %v574_v10, %v2836_v45  ;;  %v593_v41 = vadd.f32 %v577_v53, %v541_v22  ;;  %v594_v13 = vadd.f32 %v578_v54, %v542_v23 }
  0x4e   : > { %4245 = vst [vmem:[#allocation28_spill] sm:$0xff] %v2839_v46  ;;  %4246 = vst [vmem:[#allocation29_spill] sm:$0xff] %v2842_v47  ;;  %v2845_v49 = vld [vmem:[%s2722_s17 + $0x101] sm:$0xff]  ;;  %v2848_v50 = vld [vmem:[%s2722_s17 + $0x111] sm:$0xff]  ;;  %v585_v11 = vmul.f32 %v574_v10, %v2839_v46  ;;  %v586_v33 = vmul.f32 %v574_v10, %v2842_v47  ;;  %v596_v26 = vadd.f32 %v580_v25, %v544_v28 }
  0x4f   : > { %4247 = vst [vmem:[#allocation30_spill] sm:$0xff] %v2845_v49  ;;  %4248 = vst [vmem:[#allocation31_spill] sm:$0xff] %v2848_v50  ;;  %v2851_v51 = vld [vmem:[%s2722_s17 + $0x121] sm:$0xff]  ;;  %v2859_v0 = vld [vmem:[%s2722_s17 + $0x131] sm:$0xff]  ;;  %v587_v34 = vmul.f32 %v574_v10, %v2845_v49  ;;  %v588_v39 = vmul.f32 %v574_v10, %v2848_v50  ;;  %v595_v49 = vadd.f32 %v579_v5, %v543_v24 }
  0x50   : > { %4249 = vst [vmem:[#allocation32_spill] sm:$0xff] %v2851_v51  ;;  %4250 = vst [vmem:[#allocation33_spill] sm:$0xff] %v2859_v0  ;;  %v589_v32 = vmul.f32 %v574_v10, %v2851_v51  ;;  %v590_v18 = vmul.f32 %v574_v10, %v2859_v0  ;;  %v607_v45 = vld [vmem:[%s2722_s17 + $0x2] sm:$0xff]  ;;  %v2878_v46 = vld [vmem:[%s2722_s17 + $0x12] sm:$0xff]  ;;  %v597_v50 = vadd.f32 %v581_v55, %v545_v29 }
  0x51   : > { %4251 = vst [vmem:[#allocation34_spill] sm:$0xff] %v2878_v46  ;;  %v2881_v47 = vld [vmem:[%s2722_s17 + $0x22] sm:$0xff]  ;;  %v2884_v51 = vld [vmem:[%s2722_s17 + $0x32] sm:$0xff]  ;;  %v598_v21 = vadd.f32 %v582_v58, %v546_v30  ;;  %v599_v22 = vadd.f32 %v583_v20, %v547_v31  ;;  %v600_v48 = vadd.f32 %v584_v59, %v548_v35  ;;  %v601_v52 = vadd.f32 %v585_v11, %v549_v36 }
  0x52   : > { %4252 = vst [vmem:[#allocation35_spill] sm:$0xff] %v2881_v47  ;;  %4253 = vst [vmem:[#allocation36_spill] sm:$0xff] %v2884_v51  ;;  %v2887_v10 = vld [vmem:[%s2722_s17 + $0x42] sm:$0xff]  ;;  %v2890_v17 = vld [vmem:[%s2722_s17 + $0x52] sm:$0xff]  ;;  %v602_v28 = vadd.f32 %v586_v33, %v550_v37  ;;  %v603_v29 = vadd.f32 %v587_v34, %v551_v38  ;;  %v604_v53 = vadd.f32 %v588_v39, %v552_v42 }
  0x53   : > { %4254 = vst [vmem:[#allocation37_spill] sm:$0xff] %v2887_v10  ;;  %4255 = vst [vmem:[#allocation38_spill] sm:$0xff] %v2890_v17  ;;  %v2893_v23 = vld [vmem:[%s2722_s17 + $0x62] sm:$0xff]  ;;  %v2896_v24 = vld [vmem:[%s2722_s17 + $0x72] sm:$0xff]  ;;  %v605_v54 = vadd.f32 %v589_v32, %v553_v43  ;;  %v606_v20 = vadd.f32 %v590_v18, %v554_v44  ;;  %v627_v31 = vmul.f32 %v626_v57, %v607_v45 }
  0x54   : > { %4256 = vst [vmem:[#allocation39_spill] sm:$0xff] %v2893_v23  ;;  %4257 = vst [vmem:[#allocation40_spill] sm:$0xff] %v2896_v24  ;;  %v615_v55 = vld [vmem:[%s2722_s17 + $0xc2] sm:$0xff]  ;;  %v2900_v5 = vld [vmem:[%s2722_s17 + $0xd2] sm:$0xff]  ;;  %v628_v35 = vmul.f32 %v626_v57, %v2878_v46  ;;  %v629_v33 = vmul.f32 %v626_v57, %v2881_v47  ;;  %v630_v32 = vmul.f32 %v626_v57, %v2884_v51 }
  0x55   : > { %4258 = vst [vmem:[#allocation41_spill] sm:$0xff] %v2900_v5  ;;  %v2903_v25 = vld [vmem:[%s2722_s17 + $0xe2] sm:$0xff]  ;;  %v2906_v58 = vld [vmem:[%s2722_s17 + $0xf2] sm:$0xff]  ;;  %v631_v36 = vmul.f32 %v626_v57, %v2887_v10  ;;  %v632_v18 = vmul.f32 %v626_v57, %v2890_v17  ;;  %v633_v37 = vmul.f32 %v626_v57, %v2893_v23  ;;  %v634_v38 = vmul.f32 %v626_v57, %v2896_v24 }
  0x56   : > { %4259 = vst [vmem:[#allocation42_spill] sm:$0xff] %v2903_v25  ;;  %4260 = vst [vmem:[#allocation43_spill] sm:$0xff] %v2906_v58  ;;  %v2909_v30 = vld [vmem:[%s2722_s17 + $0x102] sm:$0xff]  ;;  %v2912_v59 = vld [vmem:[%s2722_s17 + $0x112] sm:$0xff]  ;;  %v635_v39 = vmul.f32 %v626_v57, %v615_v55  ;;  %v636_v42 = vmul.f32 %v626_v57, %v2900_v5  ;;  %v637_v43 = vmul.f32 %v626_v57, %v2903_v25 }
  0x57   : > { %4261 = vst [vmem:[#allocation44_spill] sm:$0xff] %v2909_v30  ;;  %4262 = vst [vmem:[#allocation45_spill] sm:$0xff] %v2912_v59  ;;  %v2915_v11 = vld [vmem:[%s2722_s17 + $0x122] sm:$0xff]  ;;  %v2920_v34 = vld [vmem:[%s2722_s17 + $0x132] sm:$0xff]  ;;  %v638_v44 = vmul.f32 %v626_v57, %v2906_v58  ;;  %v639_v45 = vmul.f32 %v626_v57, %v2909_v30  ;;  %v640_v10 = vmul.f32 %v626_v57, %v2912_v59 }
  0x58   : > { %4263 = vst [vmem:[#allocation46_spill] sm:$0xff] %v2915_v11  ;;  %4264 = vst [vmem:[#allocation47_spill] sm:$0xff] %v2920_v34  ;;  %v641_v17 = vmul.f32 %v626_v57, %v2915_v11  ;;  %v642_v23 = vmul.f32 %v626_v57, %v2920_v34  ;;  %v643_v51 = vadd.f32 %v627_v31, %v591_v27  ;;  %v659_v5 = vld [vmem:[%s2722_s17 + $0x3] sm:$0xff]  ;;  %v2936_v25 = vld [vmem:[%s2722_s17 + $0x13] sm:$0xff] }
  0x59   : > { %v644_v24 = vadd.f32 %v628_v35, %v592_v40  ;;  %v645_v55 = vadd.f32 %v629_v33, %v593_v41  ;;  %4265 = vst [vmem:[#allocation48_spill] sm:$0xff] %v2936_v25  ;;  %v2939_v58 = vld [vmem:[%s2722_s17 + $0x23] sm:$0xff]  ;;  %v646_v47 = vadd.f32 %v630_v32, %v594_v13  ;;  %v647_v30 = vadd.f32 %v631_v36, %v595_v49  ;;  %v2942_v11 = vld [vmem:[%s2722_s17 + $0x33] sm:$0xff] }
  0x5a   : > { %4266 = vst [vmem:[#allocation49_spill] sm:$0xff] %v2939_v58  ;;  %v648_v46 = vadd.f32 %v632_v18, %v596_v26  ;;  %v649_v59 = vadd.f32 %v633_v37, %v597_v50  ;;  %4267 = vst [vmem:[#allocation50_spill] sm:$0xff] %v2942_v11  ;;  %v2945_v27 = vld [vmem:[%s2722_s17 + $0x43] sm:$0xff]  ;;  %v2948_v40 = vld [vmem:[%s2722_s17 + $0x53] sm:$0xff]  ;;  %v650_v57 = vadd.f32 %v634_v38, %v598_v21 }
  0x5b   : > { %4268 = vst [vmem:[#allocation51_spill] sm:$0xff] %v2945_v27  ;;  %4269 = vst [vmem:[#allocation52_spill] sm:$0xff] %v2948_v40  ;;  %v651_v41 = vadd.f32 %v635_v39, %v599_v22  ;;  %v652_v31 = vadd.f32 %v636_v42, %v600_v48  ;;  %v653_v35 = vadd.f32 %v637_v43, %v601_v52  ;;  %v2951_v13 = vld [vmem:[%s2722_s17 + $0x63] sm:$0xff]  ;;  %v2954_v26 = vld [vmem:[%s2722_s17 + $0x73] sm:$0xff] }
  0x5c   : > { %4270 = vst [vmem:[#allocation53_spill] sm:$0xff] %v2951_v13  ;;  %4271 = vst [vmem:[#allocation54_spill] sm:$0xff] %v2954_v26  ;;  %v667_v49 = vld [vmem:[%s2722_s17 + $0xc3] sm:$0xff]  ;;  %v654_v50 = vadd.f32 %v638_v44, %v602_v28  ;;  %v655_v33 = vadd.f32 %v639_v45, %v603_v29  ;;  %v656_v32 = vadd.f32 %v640_v10, %v604_v53  ;;  %v2958_v18 = vld [vmem:[%s2722_s17 + $0xd3] sm:$0xff] }
  0x5d   : > { %v657_v36 = vadd.f32 %v641_v17, %v605_v54  ;;  %4272 = vst [vmem:[#allocation55_spill] sm:$0xff] %v2958_v18  ;;  %v2961_v37 = vld [vmem:[%s2722_s17 + $0xe3] sm:$0xff]  ;;  %v2964_v21 = vld [vmem:[%s2722_s17 + $0xf3] sm:$0xff]  ;;  %v658_v22 = vadd.f32 %v642_v23, %v606_v20  ;;  %v679_v39 = vmul.f32 %v2866_v60, %v659_v5  ;;  %v680_v28 = vmul.f32 %v2866_v60, %v2936_v25 }
  0x5e   : > { %4273 = vst [vmem:[#allocation56_spill] sm:$0xff] %v2961_v37  ;;  %4274 = vst [vmem:[#allocation57_spill] sm:$0xff] %v2964_v21  ;;  %v2967_v38 = vld [vmem:[%s2722_s17 + $0x103] sm:$0xff]  ;;  %v2970_v48 = vld [vmem:[%s2722_s17 + $0x113] sm:$0xff]  ;;  %v681_v10 = vmul.f32 %v2866_v60, %v2939_v58  ;;  %v682_v29 = vmul.f32 %v2866_v60, %v2942_v11  ;;  %v683_v23 = vmul.f32 %v2866_v60, %v2945_v27 }
  0x5f   : > { %4275 = vst [vmem:[#allocation58_spill] sm:$0xff] %v2967_v38  ;;  %4276 = vst [vmem:[#allocation59_spill] sm:$0xff] %v2970_v48  ;;  %v2973_v52 = vld [vmem:[%s2722_s17 + $0x123] sm:$0xff]  ;;  %v2981_v17 = vld [vmem:[%s2722_s17 + $0x133] sm:$0xff]  ;;  %v684_v53 = vmul.f32 %v2866_v60, %v2948_v40  ;;  %v685_v54 = vmul.f32 %v2866_v60, %v2951_v13  ;;  %v686_v5 = vmul.f32 %v2866_v60, %v2954_v26 }
  0x60   : > { %4277 = vst [vmem:[#allocation60_spill] sm:$0xff] %v2973_v52  ;;  %4278 = vst [vmem:[#allocation61_spill] sm:$0xff] %v2981_v17  ;;  %v687_v20 = vmul.f32 %v2866_v60, %v667_v49  ;;  %v688_v42 = vmul.f32 %v2866_v60, %v2958_v18  ;;  %v689_v43 = vmul.f32 %v2866_v60, %v2961_v37  ;;  %v711_v11 = vld [vmem:[%s2722_s17 + $0x4] sm:$0xff] }
  0x61   : > { %v690_v44 = vmul.f32 %v2866_v60, %v2964_v21  ;;  %v691_v45 = vmul.f32 %v2866_v60, %v2967_v38  ;;  %v692_v13 = vmul.f32 %v2866_v60, %v2970_v48  ;;  %v693_v49 = vmul.f32 %v2866_v60, %v2973_v52 }
  0x62   : > { %v694_v18 = vmul.f32 %v2866_v60, %v2981_v17  ;;  %v695_v26 = vadd.f32 %v679_v39, %v643_v51  ;;  %v696_v37 = vadd.f32 %v680_v28, %v644_v24  ;;  %v697_v40 = vadd.f32 %v681_v10, %v645_v55  ;;  %v3012_v51 = vld [vmem:[%s2722_s17 + $0x14] sm:$0xff]  ;;  %v3015_v24 = vld [vmem:[%s2722_s17 + $0x24] sm:$0xff] }
  0x63   : > { %v698_v27 = vadd.f32 %v682_v29, %v646_v47  ;;  %v699_v21 = vadd.f32 %v683_v23, %v647_v30  ;;  %v700_v38 = vadd.f32 %v684_v53, %v648_v46  ;;  %v730_v48 = vrot.slane %v2720_v56, %v2792_v19  ;;  %4279 = vst [vmem:[#allocation62_spill] sm:$0xff] %v3012_v51  ;;  %v3018_v47 = vld [vmem:[%s2722_s17 + $0x34] sm:$0xff]  ;;  %v719_v10 = vld [vmem:[%s2722_s17 + $0xc4] sm:$0xff] }
  0x64   : > { %v701_v58 = vadd.f32 %v685_v54, %v649_v59  ;;  %v702_v52 = vadd.f32 %v686_v5, %v650_v57  ;;  %v703_v25 = vadd.f32 %v687_v20, %v651_v41  ;;  %v704_v60 = vadd.f32 %v688_v42, %v652_v31  ;;  %4280 = vst [vmem:[#allocation63_spill] sm:$0xff] %v3015_v24  ;;  %v3021_v59 = vld [vmem:[%s2722_s17 + $0x44] sm:$0xff]  ;;  %v3024_v57 = vld [vmem:[%s2722_s17 + $0x54] sm:$0xff] }
  0x65   : > { %4281 = vst [vmem:[#allocation64_spill] sm:$0xff] %v3018_v47  ;;  %v705_v46 = vadd.f32 %v689_v43, %v653_v35  ;;  %v706_v30 = vadd.f32 %v690_v44, %v654_v50  ;;  %v707_v55 = vadd.f32 %v691_v45, %v655_v33  ;;  %v708_v56 = vadd.f32 %v692_v13, %v656_v32  ;;  %v3027_v41 = vld [vmem:[%s2722_s17 + $0x64] sm:$0xff]  ;;  %v3030_v28 = vld [vmem:[%s2722_s17 + $0x74] sm:$0xff] }
  0x66   : > { %4282 = vst [vmem:[#allocation65_spill] sm:$0xff] %v3021_v59  ;;  %4283 = vst [vmem:[#allocation66_spill] sm:$0xff] %v3024_v57  ;;  %v709_v31 = vadd.f32 %v693_v49, %v657_v36  ;;  %v710_v39 = vadd.f32 %v694_v18, %v658_v22  ;;  %v3034_v29 = vld [vmem:[%s2722_s17 + $0xd4] sm:$0xff]  ;;  %v784_v35 = vmul.f32 %v2775_v12, %v2734_v61  ;;  %v3041_v50 = vld [vmem:[%s2722_s17 + $0xe4] sm:$0xff] }
  0x67   : > { %4284 = vst [vmem:[#allocation67_spill] sm:$0xff] %v3027_v41  ;;  %4285 = vst [vmem:[#allocation68_spill] sm:$0xff] %v3030_v28  ;;  %v785_v13 = vmul.f32 %v2775_v12, %v2737_v62  ;;  %v3044_v33 = vld [vmem:[%s2722_s17 + $0xf4] sm:$0xff]  ;;  %v3047_v32 = vld [vmem:[%s2722_s17 + $0x104] sm:$0xff]  ;;  %v731_v36 = vmul.f32 %v730_v48, %v711_v11  ;;  %v786_v18 = vmul.f32 %v2775_v12, %v2740_v63 }
  0x68   : > { %4286 = vst [vmem:[#allocation69_spill] sm:$0xff] %v3034_v29  ;;  %4287 = vst [vmem:[#allocation70_spill] sm:$0xff] %v3041_v50  ;;  %v787_v22 = vmul.f32 %v2775_v12, %v2745_v1  ;;  %v788_v23 = vmul.f32 %v2775_v12, %v2748_v2  ;;  %v3056_v61 = vld [vmem:[%s2722_s17 + $0x114] sm:$0xff]  ;;  %v3059_v53 = vld [vmem:[%s2722_s17 + $0x124] sm:$0xff]  ;;  %v732_v5 = vmul.f32 %v730_v48, %v3012_v51 }
  0x69   : > { %4288 = vst [vmem:[#allocation71_spill] sm:$0xff] %v3044_v33  ;;  %4289 = vst [vmem:[#allocation72_spill] sm:$0xff] %v3047_v32  ;;  %v3062_v54 = vld [vmem:[%s2722_s17 + $0x134] sm:$0xff]  ;;  %v733_v20 = vmul.f32 %v730_v48, %v3015_v24  ;;  %v734_v11 = vmul.f32 %v730_v48, %v3018_v47  ;;  %v735_v42 = vmul.f32 %v730_v48, %v3021_v59  ;;  %v3079_v19 = vld [vmem:[%s2722_s17 + $0x80] sm:$0xff] }
  0x6a   : > { %4290 = vst [vmem:[#allocation73_spill] sm:$0xff] %v3056_v61  ;;  %4291 = vst [vmem:[#allocation74_spill] sm:$0xff] %v3059_v53  ;;  %v736_v43 = vmul.f32 %v730_v48, %v3024_v57  ;;  %v737_v44 = vmul.f32 %v730_v48, %v3027_v41  ;;  %v738_v45 = vmul.f32 %v730_v48, %v3030_v28 }
  0x6b   : > { %4292 = vst [vmem:[#allocation75_spill] sm:$0xff] %v3062_v54  ;;  %v739_v49 = vmul.f32 %v730_v48, %v719_v10  ;;  %v740_v2 = vmul.f32 %v730_v48, %v3034_v29  ;;  %v741_v1 = vmul.f32 %v730_v48, %v3041_v50  ;;  %v742_v51 = vmul.f32 %v730_v48, %v3044_v33 }
  0x6c   : > { %v743_v24 = vmul.f32 %v730_v48, %v3047_v32  ;;  %v744_v47 = vmul.f32 %v730_v48, %v3056_v61  ;;  %v745_v59 = vmul.f32 %v730_v48, %v3059_v53  ;;  %v746_v57 = vmul.f32 %v730_v48, %v3062_v54  ;;  %v3082_v48 = vld [vmem:[%s2722_s17 + $0x140] sm:$0xff] }
  0x6d   : > { %v747_v17 = vadd.f32 %v731_v36, %v695_v26  ;;  %v748_v41 = vadd.f32 %v732_v5, %v696_v37  ;;  %v749_v28 = vadd.f32 %v733_v20, %v697_v40  ;;  %v750_v10 = vadd.f32 %v734_v11, %v698_v27  ;;  %4293 = vst [vmem:[#allocation76_spill] sm:$0xff] %v3082_v48  ;;  %v3107_v11 = vld [vmem:[%s2722_s17 + $0x81] sm:$0xff] }
  0x6e   : > { %v751_v34 = vadd.f32 %v735_v42, %v699_v21  ;;  %v752_v29 = vadd.f32 %v736_v43, %v700_v38  ;;  %v753_v63 = vadd.f32 %v737_v44, %v701_v58  ;;  %v754_v62 = vadd.f32 %v738_v45, %v702_v52  ;;  %v4294_v21 = vld [vmem:[#allocation15_spill] sm:$0xff]  ;;  %v4295_v52 = vld [vmem:[#allocation16_spill] sm:$0xff]  ;;  %v4308_v44 = vld [vmem:[#allocation29_spill] sm:$0xff] }
  0x6f   : > { %v755_v50 = vadd.f32 %v739_v49, %v703_v25  ;;  %v756_v33 = vadd.f32 %v740_v2, %v704_v60  ;;  %v757_v32 = vadd.f32 %v741_v1, %v705_v46  ;;  %v758_v0 = vadd.f32 %v742_v51, %v706_v30  ;;  %4296 = vst [vmem:[#allocation15_spill] sm:$0xff] %v3107_v11  ;;  %v4309_v49 = vld [vmem:[#allocation30_spill] sm:$0xff] }
  0x70   : > { %v759_v61 = vadd.f32 %v743_v24, %v707_v55  ;;  %v760_v16 = vadd.f32 %v744_v47, %v708_v56  ;;  %v761_v53 = vadd.f32 %v745_v59, %v709_v31  ;;  %v762_v15 = vadd.f32 %v746_v57, %v710_v39 }
  0x71   : > { %v789_v40 = vmul.f32 %v2775_v12, %v2751_v3  ;;  %v790_v27 = vmul.f32 %v2775_v12, %v2754_v4  ;;  %v791_v25 = vmul.f32 %v3079_v19, %v2775_v12  ;;  %v792_v2 = vmul.f32 %v2775_v12, %v2758_v6 }
  0x72   : > { %v793_v1 = vmul.f32 %v2775_v12, %v2761_v7  ;;  %v794_v58 = vmul.f32 %v2775_v12, %v2764_v8  ;;  %v795_v26 = vmul.f32 %v2775_v12, %v2767_v9  ;;  %v796_v37 = vmul.f32 %v2775_v12, %v2782_v14 }
  0x73   : > { %v797_v38 = vmul.f32 %v2775_v12, %v4294_v21  ;;  %v798_v60 = vmul.f32 %v2775_v12, %v4295_v52  ;;  %v799_v6 = vmul.f32 %v3082_v48, %v2775_v12  ;;  %v800_v51 = vadd.f32 %v784_v35, %v747_v17  ;;  %v4297_v12 = vld [vmem:[#allocation20_spill] sm:$0xff]  ;;  %v4298_v17 = vld [vmem:[#allocation14_spill] sm:$0xff] }
  0x74   : > { %v801_v24 = vadd.f32 %v785_v13, %v748_v41  ;;  %v802_v47 = vadd.f32 %v786_v18, %v749_v28  ;;  %v803_v46 = vadd.f32 %v787_v22, %v750_v10  ;;  %v804_v30 = vadd.f32 %v788_v23, %v751_v34  ;;  %v4299_v28 = vld [vmem:[#allocation21_spill] sm:$0xff]  ;;  %v3114_v34 = vld [vmem:[%s2722_s17 + $0x141] sm:$0xff] }
  0x75   : > { %v805_v55 = vadd.f32 %v789_v40, %v752_v29  ;;  %v806_v56 = vadd.f32 %v790_v27, %v753_v63  ;;  %v807_v59 = vadd.f32 %v791_v25, %v754_v62  ;;  %v808_v57 = vadd.f32 %v792_v2, %v755_v50  ;;  %4300 = vst [vmem:[#allocation16_spill] sm:$0xff] %v3114_v34  ;;  %v4301_v63 = vld [vmem:[#allocation22_spill] sm:$0xff]  ;;  %v4302_v29 = vld [vmem:[#allocation23_spill] sm:$0xff]  ;;  %v4303_v13 = vld [vmem:[#allocation24_spill] sm:$0xff] }
  0x76   : > { %v809_v31 = vadd.f32 %v793_v1, %v756_v33  ;;  %v810_v39 = vadd.f32 %v794_v58, %v757_v32  ;;  %v811_v36 = vadd.f32 %v795_v26, %v758_v0  ;;  %v812_v5 = vadd.f32 %v796_v37, %v759_v61  ;;  %v4304_v50 = vld [vmem:[#allocation25_spill] sm:$0xff]  ;;  %v4305_v33 = vld [vmem:[#allocation26_spill] sm:$0xff]  ;;  %v4306_v22 = vld [vmem:[#allocation27_spill] sm:$0xff] }
  0x77   : > { %v813_v20 = vadd.f32 %v797_v38, %v760_v16  ;;  %v814_v42 = vadd.f32 %v798_v60, %v761_v53  ;;  %v815_v43 = vadd.f32 %v799_v6, %v762_v15  ;;  %v836_v41 = vmul.f32 %v4298_v17, %v4297_v12  ;;  %v4307_v61 = vld [vmem:[#allocation28_spill] sm:$0xff]  ;;  %v4310_v40 = vld [vmem:[#allocation31_spill] sm:$0xff]  ;;  %v4312_v1 = vld [vmem:[#allocation33_spill] sm:$0xff] }
  0x78   : > { %v837_v35 = vmul.f32 %v4298_v17, %v4299_v28  ;;  %v838_v62 = vmul.f32 %v4298_v17, %v4301_v63  ;;  %v839_v0 = vmul.f32 %v4298_v17, %v4302_v29  ;;  %v840_v16 = vmul.f32 %v4298_v17, %v4303_v13  ;;  %v4311_v25 = vld [vmem:[#allocation32_spill] sm:$0xff] }
  0x79   : > { %v841_v15 = vmul.f32 %v4298_v17, %v4304_v50  ;;  %v842_v32 = vmul.f32 %v4298_v17, %v4305_v33  ;;  %v843_v18 = vmul.f32 %v3107_v11, %v4298_v17  ;;  %v844_v23 = vmul.f32 %v4298_v17, %v4306_v22  ;;  %v4313_v22 = vld [vmem:[#allocation13_spill] sm:$0xff] }
  0x7a   : > { %v845_v53 = vmul.f32 %v4298_v17, %v4307_v61  ;;  %v846_v45 = vmul.f32 %v4298_v17, %v4308_v44  ;;  %v847_v10 = vmul.f32 %v4298_v17, %v4309_v49  ;;  %v848_v27 = vmul.f32 %v4298_v17, %v4310_v40  ;;  %v4314_v49 = vld [vmem:[#allocation7_spill] sm:$0xff] }
  0x7b   : > { %v849_v2 = vmul.f32 %v4298_v17, %v4311_v25  ;;  %v850_v58 = vmul.f32 %v4298_v17, %v4312_v1  ;;  %v851_v26 = vmul.f32 %v3114_v34, %v4298_v17  ;;  %v852_v37 = vadd.f32 %v836_v41, %v800_v51  ;;  %v4337_v34 = vld [vmem:[#allocation47_spill] sm:$0xff] }
  0x7c   : > { %v853_v38 = vadd.f32 %v837_v35, %v801_v24  ;;  %v854_v60 = vadd.f32 %v838_v62, %v802_v47  ;;  %v855_v6 = vadd.f32 %v839_v0, %v803_v46  ;;  %v856_v12 = vadd.f32 %v840_v16, %v804_v30  ;;  %v3147_v24 = vld [vmem:[%s2722_s17 + $0x82] sm:$0xff]  ;;  %v4316_v47 = vld [vmem:[#allocation17_spill] sm:$0xff]  ;;  %v4317_v30 = vld [vmem:[#allocation34_spill] sm:$0xff] }
  0x7d   : > { %v887_v44 = vrot.slane %v4314_v49, %v4313_v22  ;;  %v857_v61 = vadd.f32 %v841_v15, %v805_v55  ;;  %v858_v40 = vadd.f32 %v842_v32, %v806_v56  ;;  %v859_v11 = vadd.f32 %v843_v18, %v807_v59  ;;  %4315 = vst [vmem:[#allocation20_spill] sm:$0xff] %v3147_v24  ;;  %v4318_v35 = vld [vmem:[#allocation18_spill] sm:$0xff]  ;;  %v4319_v56 = vld [vmem:[#allocation9_spill] sm:$0xff]  ;;  %v4320_v59 = vld [vmem:[#allocation19_spill] sm:$0xff] }
  0x7e   : > { %v860_v25 = vadd.f32 %v844_v23, %v808_v57  ;;  %v861_v33 = vadd.f32 %v845_v53, %v809_v31  ;;  %v862_v50 = vadd.f32 %v846_v45, %v810_v39  ;;  %v863_v1 = vadd.f32 %v847_v10, %v811_v36  ;;  %v4322_v31 = vld [vmem:[#allocation10_spill] sm:$0xff]  ;;  %v3165_v36 = vld [vmem:[%s2722_s17 + $0x142] sm:$0xff]  ;;  %v4327_v62 = vld [vmem:[#allocation37_spill] sm:$0xff] }
  0x7f   : > { %v864_v13 = vadd.f32 %v848_v27, %v812_v5  ;;  %v865_v29 = vadd.f32 %v849_v2, %v813_v20  ;;  %v866_v17 = vadd.f32 %v850_v58, %v814_v42  ;;  %v867_v51 = vadd.f32 %v851_v26, %v815_v43  ;;  %4324 = vst [vmem:[#allocation7_spill] sm:$0xff] %v3165_v36  ;;  %v4325_v5 = vld [vmem:[#allocation35_spill] sm:$0xff]  ;;  %v4326_v42 = vld [vmem:[#allocation36_spill] sm:$0xff]  ;;  %v4328_v16 = vld [vmem:[#allocation38_spill] sm:$0xff] }
  0x80   : > { %v939_v46 = vrot.slane %v4314_v49, %v4316_v47  ;;  %v888_v41 = vmul.f32 %v887_v44, %v4317_v30  ;;  %v3154_v55 = vrot.slane %v4314_v49, %v4318_v35  ;;  %v3158_v57 = vmul.f32 %v4320_v59, %v4319_v56  ;;  %v4329_v32 = vld [vmem:[#allocation39_spill] sm:$0xff]  ;;  %v4330_v23 = vld [vmem:[#allocation40_spill] sm:$0xff]  ;;  %v4331_v49 = vld [vmem:[#allocation41_spill] sm:$0xff] }
  0x81   : > { %v3162_v39 = vmul.f32 %v4320_v59, %v4322_v31  ;;  %v889_v20 = vmul.f32 %v887_v44, %v4325_v5  ;;  %v890_v43 = vmul.f32 %v887_v44, %v4326_v42  ;;  %v891_v0 = vmul.f32 %v887_v44, %v4327_v62  ;;  %v4332_v27 = vld [vmem:[#allocation42_spill] sm:$0xff]  ;;  %v4333_v58 = vld [vmem:[#allocation43_spill] sm:$0xff]  ;;  %v4334_v30 = vld [vmem:[#allocation44_spill] sm:$0xff] }
  0x82   : > { %4321 = vst [vmem:[#allocation14_spill] sm:$0xff] %v3158_v57  ;;  %v892_v15 = vmul.f32 %v887_v44, %v4328_v16  ;;  %v893_v18 = vmul.f32 %v887_v44, %v4329_v32  ;;  %v894_v53 = vmul.f32 %v887_v44, %v4330_v23  ;;  %v895_v45 = vmul.f32 %v3147_v24, %v887_v44  ;;  %v4335_v31 = vld [vmem:[#allocation45_spill] sm:$0xff]  ;;  %v4336_v5 = vld [vmem:[#allocation46_spill] sm:$0xff] }
  0x83   : > { %4323 = vst [vmem:[#allocation27_spill] sm:$0xff] %v3162_v39  ;;  %v896_v10 = vmul.f32 %v887_v44, %v4331_v49  ;;  %v897_v2 = vmul.f32 %v887_v44, %v4332_v27  ;;  %v898_v26 = vmul.f32 %v887_v44, %v4333_v58  ;;  %v899_v56 = vmul.f32 %v887_v44, %v4334_v30 }
  0x84   : > { %v900_v42 = vmul.f32 %v887_v44, %v4335_v31  ;;  %v901_v62 = vmul.f32 %v887_v44, %v4336_v5  ;;  %v902_v16 = vmul.f32 %v887_v44, %v4337_v34  ;;  %v903_v32 = vmul.f32 %v3165_v36, %v887_v44  ;;  %v3183_v5 = vld [vmem:[%s2722_s17 + $0x83] sm:$0xff] }
  0x85   : > { %v904_v23 = vadd.f32 %v888_v41, %v852_v37  ;;  %v905_v63 = vadd.f32 %v889_v20, %v853_v38  ;;  %v906_v24 = vadd.f32 %v890_v43, %v854_v60  ;;  %v907_v49 = vadd.f32 %v891_v0, %v855_v6  ;;  %4338 = vst [vmem:[#allocation34_spill] sm:$0xff] %v3183_v5  ;;  %v4339_v44 = vld [vmem:[#allocation48_spill] sm:$0xff]  ;;  %v4341_v60 = vld [vmem:[#allocation49_spill] sm:$0xff]  ;;  %v4350_v0 = vld [vmem:[#allocation58_spill] sm:$0xff] }
  0x86   : > { %v908_v35 = vadd.f32 %v892_v15, %v856_v12  ;;  %v909_v27 = vadd.f32 %v893_v18, %v857_v61  ;;  %v910_v28 = vadd.f32 %v894_v53, %v858_v40  ;;  %v911_v58 = vadd.f32 %v895_v45, %v859_v11  ;;  %v3187_v38 = vld [vmem:[%s2722_s17 + $0x143] sm:$0xff]  ;;  %v4342_v12 = vld [vmem:[#allocation50_spill] sm:$0xff]  ;;  %v4349_v43 = vld [vmem:[#allocation57_spill] sm:$0xff] }
  0x87   : > { %v912_v47 = vadd.f32 %v896_v10, %v860_v25  ;;  %v913_v30 = vadd.f32 %v897_v2, %v861_v33  ;;  %v914_v22 = vadd.f32 %v898_v26, %v862_v50  ;;  %v915_v31 = vadd.f32 %v899_v56, %v863_v1  ;;  %4340 = vst [vmem:[#allocation9_spill] sm:$0xff] %v3187_v38  ;;  %v4343_v40 = vld [vmem:[#allocation51_spill] sm:$0xff]  ;;  %v4344_v25 = vld [vmem:[#allocation52_spill] sm:$0xff]  ;;  %v4345_v50 = vld [vmem:[#allocation53_spill] sm:$0xff] }
  0x88   : > { %v916_v39 = vadd.f32 %v900_v42, %v864_v13  ;;  %v917_v57 = vadd.f32 %v901_v62, %v865_v29  ;;  %v918_v34 = vadd.f32 %v902_v16, %v866_v17  ;;  %v919_v48 = vadd.f32 %v903_v32, %v867_v51  ;;  %v4346_v13 = vld [vmem:[#allocation54_spill] sm:$0xff]  ;;  %v4347_v17 = vld [vmem:[#allocation55_spill] sm:$0xff]  ;;  %v4348_v20 = vld [vmem:[#allocation56_spill] sm:$0xff] }
  0x89   : > { %v940_v37 = vmul.f32 %v939_v46, %v4339_v44  ;;  %v941_v6 = vmul.f32 %v939_v46, %v4341_v60  ;;  %v942_v61 = vmul.f32 %v939_v46, %v4342_v12  ;;  %v943_v11 = vmul.f32 %v939_v46, %v4343_v40  ;;  %v4351_v15 = vld [vmem:[#allocation59_spill] sm:$0xff]  ;;  %v4352_v18 = vld [vmem:[#allocation60_spill] sm:$0xff]  ;;  %v4353_v45 = vld [vmem:[#allocation61_spill] sm:$0xff] }
  0x8a   : > { %v944_v33 = vmul.f32 %v939_v46, %v4344_v25  ;;  %v945_v1 = vmul.f32 %v939_v46, %v4345_v50  ;;  %v946_v41 = vmul.f32 %v939_v46, %v4346_v13  ;;  %v947_v29 = vmul.f32 %v3183_v5, %v939_v46 }
  0x8b   : > { %v948_v51 = vmul.f32 %v939_v46, %v4347_v17  ;;  %v949_v42 = vmul.f32 %v939_v46, %v4348_v20  ;;  %v950_v62 = vmul.f32 %v939_v46, %v4349_v43  ;;  %v951_v16 = vmul.f32 %v939_v46, %v4350_v0 }
  0x8c   : > { %v952_v32 = vmul.f32 %v939_v46, %v4351_v15  ;;  %v953_v53 = vmul.f32 %v939_v46, %v4352_v18  ;;  %v954_v10 = vmul.f32 %v939_v46, %v4353_v45  ;;  %v955_v2 = vmul.f32 %v3187_v38, %v939_v46  ;;  %v3205_v18 = vld [vmem:[%s2722_s17 + $0x84] sm:$0xff]  ;;  %v4355_v46 = vld [vmem:[#allocation62_spill] sm:$0xff] }
  0x8d   : > { %v956_v26 = vadd.f32 %v940_v37, %v904_v23  ;;  %v957_v56 = vadd.f32 %v941_v6, %v905_v63  ;;  %v958_v44 = vadd.f32 %v942_v61, %v906_v24  ;;  %v959_v17 = vadd.f32 %v943_v11, %v907_v49  ;;  %4354 = vst [vmem:[#allocation19_spill] sm:$0xff] %v3205_v18  ;;  %v3210_v24 = vld [vmem:[%s2722_s17 + $0x144] sm:$0xff]  ;;  %v4362_v49 = vld [vmem:[#allocation69_spill] sm:$0xff]  ;;  %v4363_v6 = vld [vmem:[#allocation70_spill] sm:$0xff] }
  0x8e   : > { %v960_v5 = vadd.f32 %v944_v33, %v908_v35  ;;  %v961_v20 = vadd.f32 %v945_v1, %v909_v27  ;;  %v962_v13 = vadd.f32 %v946_v41, %v910_v28  ;;  %v963_v43 = vadd.f32 %v947_v29, %v911_v58  ;;  %v4356_v23 = vld [vmem:[#allocation63_spill] sm:$0xff]  ;;  %v4357_v28 = vld [vmem:[#allocation64_spill] sm:$0xff]  ;;  %v4358_v27 = vld [vmem:[#allocation65_spill] sm:$0xff] }
  0x8f   : > { %v964_v50 = vadd.f32 %v948_v51, %v912_v47  ;;  %v965_v0 = vadd.f32 %v949_v42, %v913_v30  ;;  %v966_v25 = vadd.f32 %v950_v62, %v914_v22  ;;  %v967_v15 = vadd.f32 %v951_v16, %v915_v31  ;;  %v4364_v11 = vld [vmem:[#allocation71_spill] sm:$0xff]  ;;  %v4365_v1 = vld [vmem:[#allocation72_spill] sm:$0xff]  ;;  %v4366_v29 = vld [vmem:[#allocation73_spill] sm:$0xff] }
  0x90   : > { %v968_v40 = vadd.f32 %v952_v32, %v916_v39  ;;  %v969_v12 = vadd.f32 %v953_v53, %v917_v57  ;;  %v970_v45 = vadd.f32 %v954_v10, %v918_v34  ;;  %v971_v60 = vadd.f32 %v955_v2, %v919_v48  ;;  %v4359_v39 = vld [vmem:[#allocation66_spill] sm:$0xff]  ;;  %v4360_v57 = vld [vmem:[#allocation67_spill] sm:$0xff]  ;;  %v4361_v34 = vld [vmem:[#allocation68_spill] sm:$0xff] }
  0x91   : > { %v992_v63 = vmul.f32 %v3154_v55, %v4355_v46  ;;  %v993_v35 = vmul.f32 %v3154_v55, %v4356_v23  ;;  %v994_v47 = vmul.f32 %v3154_v55, %v4357_v28  ;;  %v995_v22 = vmul.f32 %v3154_v55, %v4358_v27  ;;  %v4367_v42 = vld [vmem:[#allocation74_spill] sm:$0xff] }
  0x92   : > { %v996_v58 = vmul.f32 %v3154_v55, %v4359_v39  ;;  %v997_v48 = vmul.f32 %v3154_v55, %v4360_v57  ;;  %v998_v30 = vmul.f32 %v3154_v55, %v4361_v34  ;;  %v999_v31 = vmul.f32 %v3205_v18, %v3154_v55  ;;  %v3243_v39 = vld [vmem:[%s2722_s17 + $0x90] sm:$0xff] }
  0x93   : > { %v1000_v37 = vmul.f32 %v3154_v55, %v4362_v49  ;;  %v1001_v61 = vmul.f32 %v3154_v55, %v4363_v6  ;;  %v1002_v33 = vmul.f32 %v3154_v55, %v4364_v11  ;;  %v1003_v41 = vmul.f32 %v3154_v55, %v4365_v1 }
  0x94   : > { %v1004_v51 = vmul.f32 %v3154_v55, %v4366_v29  ;;  %v1005_v62 = vmul.f32 %v3154_v55, %v4367_v42  ;;  %v1006_v16 = vmul.f32 %v3154_v55, %v3062_v54  ;;  %v1007_v32 = vmul.f32 %v3210_v24, %v3154_v55  ;;  %v4368_v55 = vld [vmem:[#allocation11_spill] sm:$0xff] }
  0x95   : > { %v1008_v53 = vadd.f32 %v992_v63, %v956_v26  ;;  %v1009_v10 = vadd.f32 %v993_v35, %v957_v56  ;;  %v1010_v2 = vadd.f32 %v994_v47, %v958_v44  ;;  %v1011_v46 = vadd.f32 %v995_v22, %v959_v17  ;;  %v3248_v56 = vld [vmem:[%s2722_s17 + $0x150] sm:$0xff]  ;;  %v4370_v44 = vld [vmem:[#allocation12_spill] sm:$0xff]  ;;  %v4373_v17 = vld [vmem:[#allocation27_spill] sm:$0xff] }
  0x96   : > { %v1012_v49 = vadd.f32 %v996_v58, %v960_v5  ;;  %v1013_v1 = vadd.f32 %v997_v48, %v961_v20  ;;  %v1014_v11 = vadd.f32 %v998_v30, %v962_v13  ;;  %v1015_v6 = vadd.f32 %v999_v31, %v963_v43  ;;  %4369 = vst [vmem:[#allocation10_spill] sm:$0xff] %v3248_v56  ;;  %v4374_v22 = vld [vmem:[#allocation6_spill] sm:$0xff] }
  0x97   : > { %v1016_v29 = vadd.f32 %v1000_v37, %v964_v50  ;;  %v1017_v18 = vadd.f32 %v1001_v61, %v965_v0  ;;  %v1018_v34 = vadd.f32 %v1002_v33, %v966_v25  ;;  %v1019_v42 = vadd.f32 %v1003_v41, %v967_v15  ;;  %v4371_v0 = vld [vmem:[#allocation76_spill] sm:$0xff]  ;;  %v3281_v48 = vld [vmem:[%s2717_s21 + $0x18] sm:$0x1f] }
  0x98   : > { %v1020_v57 = vadd.f32 %v1004_v51, %v968_v40  ;;  %v1021_v54 = vadd.f32 %v1005_v62, %v969_v12  ;;  %v1022_v27 = vadd.f32 %v1006_v16, %v970_v45  ;;  %v1023_v28 = vadd.f32 %v1007_v32, %v971_v60  ;;  %v4372_v45 = vld [vmem:[#allocation14_spill] sm:$0xff]  ;;  %4376 = vst [vmem:[#allocation41_spill] sm:$0xff] %v3281_v48  ;;  %v4378_v32 = vld [vmem:[#allocation13_spill] sm:$0xff] }
  0x99   : > { %v1047_v26 = vmul.f32 %v4320_v59, %v4368_v55  ;;  %v1048_v5 = vmul.f32 %v4320_v59, %v4370_v44  ;;  %v1049_v50 = vmul.f32 %v4320_v59, %v2751_v3  ;;  %v1050_v25 = vmul.f32 %v4320_v59, %v2754_v4  ;;  %v3284_v16 = vld [vmem:[%s2722_s17 + $0x91] sm:$0xff] }
  0x9a   : > { %v1051_v40 = vmul.f32 %v3079_v19, %v4320_v59  ;;  %v1052_v60 = vmul.f32 %v3243_v39, %v4320_v59  ;;  %v1053_v12 = vmul.f32 %v4320_v59, %v2761_v7  ;;  %v1054_v13 = vmul.f32 %v4320_v59, %v2764_v8  ;;  %4377 = vst [vmem:[#allocation48_spill] sm:$0xff] %v3284_v16 }
  0x9b   : > { %v1055_v20 = vmul.f32 %v4320_v59, %v2767_v9  ;;  %v1056_v3 = vmul.f32 %v4320_v59, %v2782_v14  ;;  %v1057_v4 = vmul.f32 %v4320_v59, %v4294_v21  ;;  %v1058_v43 = vmul.f32 %v4320_v59, %v4295_v52  ;;  %v4375_v21 = vld [vmem:[#allocation8_spill] sm:$0xff] }
  0x9c   : > { %v1059_v15 = vmul.f32 %v4371_v0, %v4320_v59  ;;  %v1060_v7 = vmul.f32 %v3248_v56, %v4320_v59  ;;  %v1061_v8 = vadd.f32 %v4372_v45, %v1008_v53  ;;  %v1062_v63 = vadd.f32 %v4373_v17, %v1009_v10  ;;  %v4379_v53 = vld [vmem:[#allocation17_spill] sm:$0xff]  ;;  %v4394_v45 = vld [vmem:[#allocation32_spill] sm:$0xff] }
  0x9d   : > { %v1063_v9 = vadd.f32 %v1047_v26, %v1010_v2  ;;  %v1064_v35 = vadd.f32 %v1048_v5, %v1011_v46  ;;  %v1065_v14 = vadd.f32 %v1049_v50, %v1012_v49  ;;  %v1066_v47 = vadd.f32 %v1050_v25, %v1013_v1  ;;  %v4381_v2 = vld [vmem:[#allocation18_spill] sm:$0xff]  ;;  %v4386_v49 = vld [vmem:[#allocation24_spill] sm:$0xff]  ;;  %v4387_v26 = vld [vmem:[#allocation25_spill] sm:$0xff] }
  0x9e   : > { %v1096_v58 = vrot.slane %v4375_v21, %v4374_v22  ;;  %v1067_v52 = vadd.f32 %v1051_v40, %v1014_v11  ;;  %v1068_v30 = vadd.f32 %v1052_v60, %v1015_v6  ;;  %v1069_v31 = vadd.f32 %v1053_v12, %v1016_v29  ;;  %v4380_v11 = vld [vmem:[#allocation21_spill] sm:$0xff]  ;;  %v4388_v5 = vld [vmem:[#allocation26_spill] sm:$0xff]  ;;  %v4389_v25 = vld [vmem:[#allocation15_spill] sm:$0xff] }
  0x9f   : > { %v1070_v37 = vadd.f32 %v1054_v13, %v1017_v18  ;;  %v1071_v59 = vadd.f32 %v1055_v20, %v1018_v34  ;;  %v1072_v61 = vadd.f32 %v1056_v3, %v1019_v42  ;;  %v1073_v33 = vadd.f32 %v1057_v4, %v1020_v57  ;;  %v4382_v34 = vld [vmem:[#allocation5_spill] sm:$0xff]  ;;  %v4384_v57 = vld [vmem:[#allocation22_spill] sm:$0xff]  ;;  %v4385_v42 = vld [vmem:[#allocation23_spill] sm:$0xff] }
  0xa0   : > { %v1074_v41 = vadd.f32 %v1058_v43, %v1021_v54  ;;  %v1075_v51 = vadd.f32 %v1059_v15, %v1022_v27  ;;  %v1076_v62 = vadd.f32 %v1060_v7, %v1023_v28  ;;  %v1148_v1 = vrot.slane %v4375_v21, %v4378_v32  ;;  %v3306_v27 = vld [vmem:[%s2722_s17 + $0x151] sm:$0xff]  ;;  %v4390_v12 = vld [vmem:[#allocation28_spill] sm:$0xff]  ;;  %v4393_v15 = vld [vmem:[#allocation31_spill] sm:$0xff] }
  0xa1   : > { %v3290_v10 = vrot.slane %v4375_v21, %v4379_v53  ;;  %v1097_v6 = vmul.f32 %v1096_v58, %v4380_v11  ;;  %v3295_v18 = vrot.slane %v4375_v21, %v4381_v2  ;;  %v3299_v54 = vrot.slane %v3281_v48, %v4382_v34  ;;  %4383 = vst [vmem:[#allocation55_spill] sm:$0xff] %v3306_v27  ;;  %v4391_v20 = vld [vmem:[#allocation29_spill] sm:$0xff]  ;;  %v4392_v4 = vld [vmem:[#allocation30_spill] sm:$0xff] }
  0xa2   : > { %v3303_v28 = vrot.slane %v3281_v48, %v4374_v22  ;;  %v1098_v29 = vmul.f32 %v1096_v58, %v4384_v57  ;;  %v1099_v46 = vmul.f32 %v1096_v58, %v4385_v42  ;;  %v1100_v55 = vmul.f32 %v1096_v58, %v4386_v49  ;;  %v4395_v21 = vld [vmem:[#allocation33_spill] sm:$0xff]  ;;  %v4396_v57 = vld [vmem:[#allocation16_spill] sm:$0xff] }
  0xa3   : > { %v1101_v44 = vmul.f32 %v1096_v58, %v4387_v26  ;;  %v1102_v50 = vmul.f32 %v1096_v58, %v4388_v5  ;;  %v1103_v40 = vmul.f32 %v4389_v25, %v1096_v58  ;;  %v1104_v60 = vmul.f32 %v3284_v16, %v1096_v58 }
  0xa4   : > { %v1105_v13 = vmul.f32 %v1096_v58, %v4390_v12  ;;  %v1106_v3 = vmul.f32 %v1096_v58, %v4391_v20  ;;  %v1107_v43 = vmul.f32 %v1096_v58, %v4392_v4  ;;  %v1108_v7 = vmul.f32 %v1096_v58, %v4393_v15 }
  0xa5   : > { %v1109_v17 = vmul.f32 %v1096_v58, %v4394_v45  ;;  %v1110_v11 = vmul.f32 %v1096_v58, %v4395_v21  ;;  %v1111_v42 = vmul.f32 %v4396_v57, %v1096_v58  ;;  %v1112_v49 = vmul.f32 %v3306_v27, %v1096_v58  ;;  %v3324_v21 = vld [vmem:[%s2722_s17 + $0x92] sm:$0xff]  ;;  %v4398_v58 = vld [vmem:[#allocation35_spill] sm:$0xff] }
  0xa6   : > { %v1113_v26 = vadd.f32 %v1097_v6, %v1061_v8  ;;  %v1114_v5 = vadd.f32 %v1098_v29, %v1062_v63  ;;  %v1115_v22 = vadd.f32 %v1099_v46, %v1063_v9  ;;  %v1116_v12 = vadd.f32 %v1100_v55, %v1064_v35  ;;  %4397 = vst [vmem:[#allocation62_spill] sm:$0xff] %v3324_v21  ;;  %v3328_v63 = vld [vmem:[%s2722_s17 + $0x152] sm:$0xff]  ;;  %v4400_v9 = vld [vmem:[#allocation36_spill] sm:$0xff]  ;;  %v4407_v29 = vld [vmem:[#allocation43_spill] sm:$0xff] }
  0xa7   : > { %v1117_v34 = vadd.f32 %v1101_v44, %v1065_v14  ;;  %v1118_v20 = vadd.f32 %v1102_v50, %v1066_v47  ;;  %v1119_v2 = vadd.f32 %v1103_v40, %v1067_v52  ;;  %v1120_v4 = vadd.f32 %v1104_v60, %v1068_v30  ;;  %4399 = vst [vmem:[#allocation63_spill] sm:$0xff] %v3328_v63  ;;  %v4401_v14 = vld [vmem:[#allocation37_spill] sm:$0xff]  ;;  %v4402_v52 = vld [vmem:[#allocation38_spill] sm:$0xff]  ;;  %v4408_v55 = vld [vmem:[#allocation44_spill] sm:$0xff] }
  0xa8   : > { %v1121_v53 = vadd.f32 %v1105_v13, %v1069_v31  ;;  %v1122_v15 = vadd.f32 %v1106_v3, %v1070_v37  ;;  %v1123_v48 = vadd.f32 %v1107_v43, %v1071_v59  ;;  %v1124_v45 = vadd.f32 %v1108_v7, %v1072_v61  ;;  %v4403_v31 = vld [vmem:[#allocation39_spill] sm:$0xff]  ;;  %v4404_v59 = vld [vmem:[#allocation40_spill] sm:$0xff]  ;;  %v4409_v50 = vld [vmem:[#allocation45_spill] sm:$0xff] }
  0xa9   : > { %v1125_v32 = vadd.f32 %v1109_v17, %v1073_v33  ;;  %v1126_v16 = vadd.f32 %v1110_v11, %v1074_v41  ;;  %v1127_v57 = vadd.f32 %v1111_v42, %v1075_v51  ;;  %v1128_v25 = vadd.f32 %v1112_v49, %v1076_v62  ;;  %v4405_v33 = vld [vmem:[#allocation20_spill] sm:$0xff]  ;;  %v4406_v51 = vld [vmem:[#allocation42_spill] sm:$0xff]  ;;  %v4411_v3 = vld [vmem:[#allocation47_spill] sm:$0xff] }
  0xaa   : > { %v1149_v8 = vmul.f32 %v1148_v1, %v4398_v58  ;;  %v1150_v35 = vmul.f32 %v1148_v1, %v4400_v9  ;;  %v1151_v47 = vmul.f32 %v1148_v1, %v4401_v14  ;;  %v1152_v30 = vmul.f32 %v1148_v1, %v4402_v52  ;;  %v4410_v60 = vld [vmem:[#allocation46_spill] sm:$0xff] }
  0xab   : > { %v1153_v37 = vmul.f32 %v1148_v1, %v4403_v31  ;;  %v1154_v61 = vmul.f32 %v1148_v1, %v4404_v59  ;;  %v1155_v6 = vmul.f32 %v4405_v33, %v1148_v1  ;;  %v1156_v41 = vmul.f32 %v3324_v21, %v1148_v1 }
  0xac   : > { %v1157_v62 = vmul.f32 %v1148_v1, %v4406_v51  ;;  %v1158_v46 = vmul.f32 %v1148_v1, %v4407_v29  ;;  %v1159_v44 = vmul.f32 %v1148_v1, %v4408_v55  ;;  %v1160_v40 = vmul.f32 %v1148_v1, %v4409_v50 }
  0xad   : > { %v1161_v13 = vmul.f32 %v1148_v1, %v4410_v60  ;;  %v1162_v43 = vmul.f32 %v1148_v1, %v4411_v3  ;;  %v1163_v7 = vmul.f32 %v3165_v36, %v1148_v1  ;;  %v1164_v17 = vmul.f32 %v3328_v63, %v1148_v1  ;;  %v3346_v60 = vld [vmem:[%s2722_s17 + $0x93] sm:$0xff] }
  0xae   : > { %v1165_v11 = vadd.f32 %v1149_v8, %v1113_v26  ;;  %v1166_v42 = vadd.f32 %v1150_v35, %v1114_v5  ;;  %v1167_v49 = vadd.f32 %v1151_v47, %v1115_v22  ;;  %v1168_v58 = vadd.f32 %v1152_v30, %v1116_v12  ;;  %4412 = vst [vmem:[#allocation69_spill] sm:$0xff] %v3346_v60  ;;  %v4413_v1 = vld [vmem:[#allocation49_spill] sm:$0xff]  ;;  %v4415_v5 = vld [vmem:[#allocation50_spill] sm:$0xff]  ;;  %v4417_v12 = vld [vmem:[#allocation52_spill] sm:$0xff] }
  0xaf   : > { %v1169_v9 = vadd.f32 %v1153_v37, %v1117_v34  ;;  %v1170_v14 = vadd.f32 %v1154_v61, %v1118_v20  ;;  %v1171_v52 = vadd.f32 %v1155_v6, %v1119_v2  ;;  %v1172_v31 = vadd.f32 %v1156_v41, %v1120_v4  ;;  %v3351_v22 = vld [vmem:[%s2722_s17 + $0x153] sm:$0xff]  ;;  %v4416_v2 = vld [vmem:[#allocation51_spill] sm:$0xff]  ;;  %v4425_v41 = vld [vmem:[#allocation60_spill] sm:$0xff] }
  0xb0   : > { %v1173_v59 = vadd.f32 %v1157_v62, %v1121_v53  ;;  %v1174_v51 = vadd.f32 %v1158_v46, %v1122_v15  ;;  %v1175_v29 = vadd.f32 %v1159_v44, %v1123_v48  ;;  %v1176_v55 = vadd.f32 %v1160_v40, %v1124_v45  ;;  %4414 = vst [vmem:[#allocation11_spill] sm:$0xff] %v3351_v22  ;;  %v4421_v45 = vld [vmem:[#allocation56_spill] sm:$0xff]  ;;  %v4422_v35 = vld [vmem:[#allocation57_spill] sm:$0xff]  ;;  %v4423_v30 = vld [vmem:[#allocation58_spill] sm:$0xff] }
  0xb1   : > { %v1177_v50 = vadd.f32 %v1161_v13, %v1125_v32  ;;  %v1178_v3 = vadd.f32 %v1162_v43, %v1126_v16  ;;  %v1179_v36 = vadd.f32 %v1163_v7, %v1127_v57  ;;  %v1180_v21 = vadd.f32 %v1164_v17, %v1128_v25  ;;  %v4418_v32 = vld [vmem:[#allocation53_spill] sm:$0xff]  ;;  %v4419_v16 = vld [vmem:[#allocation54_spill] sm:$0xff]  ;;  %v4424_v61 = vld [vmem:[#allocation59_spill] sm:$0xff] }
  0xb2   : > { %v1201_v26 = vmul.f32 %v3290_v10, %v4413_v1  ;;  %v1202_v34 = vmul.f32 %v3290_v10, %v4415_v5  ;;  %v1203_v53 = vmul.f32 %v3290_v10, %v4416_v2  ;;  %v1204_v48 = vmul.f32 %v3290_v10, %v4417_v12  ;;  %v4420_v57 = vld [vmem:[#allocation34_spill] sm:$0xff]  ;;  %v4426_v46 = vld [vmem:[#allocation61_spill] sm:$0xff] }
  0xb3   : > { %v1205_v20 = vmul.f32 %v3290_v10, %v4418_v32  ;;  %v1206_v25 = vmul.f32 %v3290_v10, %v4419_v16  ;;  %v1207_v4 = vmul.f32 %v4420_v57, %v3290_v10  ;;  %v1208_v15 = vmul.f32 %v3346_v60, %v3290_v10 }
  0xb4   : > { %v1209_v8 = vmul.f32 %v3290_v10, %v4421_v45  ;;  %v1210_v47 = vmul.f32 %v3290_v10, %v4422_v35  ;;  %v1211_v37 = vmul.f32 %v3290_v10, %v4423_v30  ;;  %v1212_v6 = vmul.f32 %v3290_v10, %v4424_v61 }
  0xb5   : > { %v1213_v62 = vmul.f32 %v3290_v10, %v4425_v41  ;;  %v1214_v44 = vmul.f32 %v3290_v10, %v4426_v46  ;;  %v1215_v40 = vmul.f32 %v3187_v38, %v3290_v10  ;;  %v1216_v13 = vmul.f32 %v3351_v22, %v3290_v10  ;;  %v3384_v41 = vld [vmem:[%s2722_s17 + $0x94] sm:$0xff] }
  0xb6   : > { %v1217_v43 = vadd.f32 %v1201_v26, %v1165_v11  ;;  %v1218_v7 = vadd.f32 %v1202_v34, %v1166_v42  ;;  %v1219_v17 = vadd.f32 %v1203_v53, %v1167_v49  ;;  %v1220_v1 = vadd.f32 %v1204_v48, %v1168_v58  ;;  %4427 = vst [vmem:[#allocation12_spill] sm:$0xff] %v3384_v41  ;;  %v3389_v11 = vld [vmem:[%s2722_s17 + $0x154] sm:$0xff]  ;;  %v4429_v42 = vld [vmem:[#allocation64_spill] sm:$0xff] }
  0xb7   : > { %v1221_v5 = vadd.f32 %v1205_v20, %v1169_v9  ;;  %v1222_v2 = vadd.f32 %v1206_v25, %v1170_v14  ;;  %v1223_v12 = vadd.f32 %v1207_v4, %v1171_v52  ;;  %v1224_v32 = vadd.f32 %v1208_v15, %v1172_v31  ;;  %4428 = vst [vmem:[#allocation76_spill] sm:$0xff] %v3389_v11  ;;  %v4430_v58 = vld [vmem:[#allocation65_spill] sm:$0xff]  ;;  %v4431_v14 = vld [vmem:[#allocation66_spill] sm:$0xff]  ;;  %v4432_v31 = vld [vmem:[#allocation67_spill] sm:$0xff] }
  0xb8   : > { %v1225_v16 = vadd.f32 %v1209_v8, %v1173_v59  ;;  %v1226_v45 = vadd.f32 %v1210_v47, %v1174_v51  ;;  %v1227_v35 = vadd.f32 %v1211_v37, %v1175_v29  ;;  %v1228_v30 = vadd.f32 %v1212_v6, %v1176_v55  ;;  %v4433_v51 = vld [vmem:[#allocation68_spill] sm:$0xff]  ;;  %v4435_v55 = vld [vmem:[#allocation70_spill] sm:$0xff]  ;;  %v4438_v48 = vld [vmem:[#allocation73_spill] sm:$0xff] }
  0xb9   : > { %v1229_v61 = vadd.f32 %v1213_v62, %v1177_v50  ;;  %v1230_v46 = vadd.f32 %v1214_v44, %v1178_v3  ;;  %v1231_v38 = vadd.f32 %v1215_v40, %v1179_v36  ;;  %v1232_v60 = vadd.f32 %v1216_v13, %v1180_v21  ;;  %v4434_v21 = vld [vmem:[#allocation19_spill] sm:$0xff]  ;;  %v4437_v34 = vld [vmem:[#allocation72_spill] sm:$0xff]  ;;  %v4439_v25 = vld [vmem:[#allocation74_spill] sm:$0xff] }
  0xba   : > { %v1253_v10 = vmul.f32 %v3295_v18, %v4356_v23  ;;  %v1254_v49 = vmul.f32 %v3295_v18, %v4429_v42  ;;  %v1255_v9 = vmul.f32 %v3295_v18, %v4430_v58  ;;  %v1256_v52 = vmul.f32 %v3295_v18, %v4431_v14  ;;  %v4436_v3 = vld [vmem:[#allocation71_spill] sm:$0xff]  ;;  %v2310_v42 = vld [vmem:[%s2722_s17 + $0x30] sm:$0xff] }
  0xbb   : > { %v1257_v59 = vmul.f32 %v3295_v18, %v4432_v31  ;;  %v1258_v36 = vmul.f32 %v3295_v18, %v4433_v51  ;;  %v1259_v23 = vmul.f32 %v4434_v21, %v3295_v18  ;;  %v1260_v29 = vmul.f32 %v3384_v41, %v3295_v18  ;;  %v4440_v15 = vld [vmem:[#allocation75_spill] sm:$0xff] }
  0xbc   : > { %v1261_v50 = vmul.f32 %v3295_v18, %v4435_v55  ;;  %v1262_v26 = vmul.f32 %v3295_v18, %v4436_v3  ;;  %v1263_v53 = vmul.f32 %v3295_v18, %v4437_v34  ;;  %v1264_v20 = vmul.f32 %v3295_v18, %v4438_v48  ;;  %v3423_v58 = vld [vmem:[%s2722_s17 + $0x40] sm:$0xff]  ;;  %v3426_v3 = vld [vmem:[%s2722_s17 + $0x50] sm:$0xff] }
  0xbd   : > { %v1265_v4 = vmul.f32 %v3295_v18, %v4439_v25  ;;  %v1266_v8 = vmul.f32 %v3295_v18, %v4440_v15  ;;  %v1267_v47 = vmul.f32 %v3210_v24, %v3295_v18  ;;  %v1268_v37 = vmul.f32 %v3389_v11, %v3295_v18  ;;  %v3429_v18 = vld [vmem:[%s2722_s17 + $0x60] sm:$0xff] }
  0xbe   : > { %v1269_v6 = vadd.f32 %v1253_v10, %v1217_v43  ;;  %v1270_v62 = vadd.f32 %v1254_v49, %v1218_v7  ;;  %v1271_v44 = vadd.f32 %v1255_v9, %v1219_v17  ;;  %v1272_v40 = vadd.f32 %v1256_v52, %v1220_v1  ;;  %v3432_v43 = vld [vmem:[%s2722_s17 + $0x70] sm:$0xff]  ;;  %v3435_v10 = vld [vmem:[%s2722_s17 + $0xa0] sm:$0xff] }
  0xbf   : > { %v1273_v13 = vadd.f32 %v1257_v59, %v1221_v5  ;;  %v1274_v14 = vadd.f32 %v1258_v36, %v1222_v2  ;;  %v1275_v31 = vadd.f32 %v1259_v23, %v1223_v12  ;;  %v1276_v51 = vadd.f32 %v1260_v29, %v1224_v32  ;;  %v2318_v2 = vld [vmem:[%s2722_s17 + $0xf0] sm:$0xff]  ;;  %v3439_v12 = vld [vmem:[%s2722_s17 + $0x100] sm:$0xff] }
  0xc0   : > { %v1277_v55 = vadd.f32 %v1261_v50, %v1225_v16  ;;  %v1278_v7 = vadd.f32 %v1262_v26, %v1226_v45  ;;  %v1279_v17 = vadd.f32 %v1263_v53, %v1227_v35  ;;  %v1280_v1 = vadd.f32 %v1264_v20, %v1228_v30  ;;  %v3442_v9 = vld [vmem:[%s2722_s17 + $0x110] sm:$0xff]  ;;  %v3445_v52 = vld [vmem:[%s2722_s17 + $0x120] sm:$0xff] }
  0xc1   : > { %v1281_v5 = vadd.f32 %v1265_v4, %v1229_v61  ;;  %v1282_v32 = vadd.f32 %v1266_v8, %v1230_v46  ;;  %v1283_v49 = vadd.f32 %v1267_v47, %v1231_v38  ;;  %v1284_v16 = vadd.f32 %v1268_v37, %v1232_v60  ;;  %4441 = vst [vmem:[#allocation14_spill] sm:$0xff] %v3445_v52  ;;  %v3448_v59 = vld [vmem:[%s2722_s17 + $0x130] sm:$0xff]  ;;  %v3452_v45 = vld [vmem:[%s2722_s17 + $0x160] sm:$0xff] }
  0xc2   : > { %4442 = vst [vmem:[#allocation27_spill] sm:$0xff] %v3448_v59  ;;  %v1306_v36 = vmul.f32 %v2310_v42, %v3299_v54  ;;  %v1307_v35 = vmul.f32 %v3423_v58, %v3299_v54  ;;  %v1308_v30 = vmul.f32 %v3426_v3, %v3299_v54  ;;  %v1309_v38 = vmul.f32 %v3429_v18, %v3299_v54  ;;  %v2326_v37 = vld [vmem:[%s2722_s17 + $0x31] sm:$0xff]  ;;  %v3485_v42 = vld [vmem:[%s2722_s17 + $0x41] sm:$0xff] }
  0xc3   : > { %v1310_v60 = vmul.f32 %v3432_v43, %v3299_v54  ;;  %v1311_v61 = vmul.f32 %v3079_v19, %v3299_v54  ;;  %v1312_v46 = vmul.f32 %v3243_v39, %v3299_v54  ;;  %v1313_v23 = vmul.f32 %v3435_v10, %v3299_v54  ;;  %4443 = vst [vmem:[#allocation8_spill] sm:$0xff] %v3485_v42 }
  0xc4   : > { %v1314_v29 = vmul.f32 %v2318_v2, %v3299_v54  ;;  %v1315_v50 = vmul.f32 %v3439_v12, %v3299_v54  ;;  %v1316_v26 = vmul.f32 %v3442_v9, %v3299_v54  ;;  %v1317_v34 = vmul.f32 %v3445_v52, %v3299_v54  ;;  %v3488_v52 = vld [vmem:[%s2722_s17 + $0x51] sm:$0xff] }
  0xc5   : > { %v1318_v19 = vmul.f32 %v3448_v59, %v3299_v54  ;;  %v1319_v53 = vmul.f32 %v4371_v0, %v3299_v54  ;;  %v1320_v48 = vmul.f32 %v3248_v56, %v3299_v54  ;;  %v1321_v20 = vmul.f32 %v3452_v45, %v3299_v54  ;;  %4444 = vst [vmem:[#allocation21_spill] sm:$0xff] %v3488_v52  ;;  %v3491_v54 = vld [vmem:[%s2722_s17 + $0x61] sm:$0xff] }
  0xc6   : > { %v1322_v25 = vadd.f32 %v1306_v36, %v1269_v6  ;;  %v1323_v4 = vadd.f32 %v1307_v35, %v1270_v62  ;;  %v1324_v15 = vadd.f32 %v1308_v30, %v1271_v44  ;;  %v1325_v8 = vadd.f32 %v1309_v38, %v1272_v40  ;;  %4445 = vst [vmem:[#allocation22_spill] sm:$0xff] %v3491_v54  ;;  %v3494_v6 = vld [vmem:[%s2722_s17 + $0x71] sm:$0xff]  ;;  %v3497_v36 = vld [vmem:[%s2722_s17 + $0xa1] sm:$0xff] }
  0xc7   : > { %v1326_v47 = vadd.f32 %v1310_v60, %v1273_v13  ;;  %v1327_v2 = vadd.f32 %v1311_v61, %v1274_v14  ;;  %v1328_v0 = vadd.f32 %v1312_v46, %v1275_v31  ;;  %v1329_v59 = vadd.f32 %v1313_v23, %v1276_v51  ;;  %4446 = vst [vmem:[#allocation23_spill] sm:$0xff] %v3494_v6  ;;  %v2334_v14 = vld [vmem:[%s2722_s17 + $0xf1] sm:$0xff]  ;;  %v3501_v31 = vld [vmem:[%s2722_s17 + $0x101] sm:$0xff] }
  0xc8   : > { %v1330_v56 = vadd.f32 %v1314_v29, %v1277_v55  ;;  %v1331_v62 = vadd.f32 %v1315_v50, %v1278_v7  ;;  %v1332_v44 = vadd.f32 %v1316_v26, %v1279_v17  ;;  %v1333_v40 = vadd.f32 %v1317_v34, %v1280_v1  ;;  %4447 = vst [vmem:[#allocation24_spill] sm:$0xff] %v3497_v36  ;;  %v3504_v30 = vld [vmem:[%s2722_s17 + $0x111] sm:$0xff]  ;;  %v3507_v38 = vld [vmem:[%s2722_s17 + $0x121] sm:$0xff] }
  0xc9   : > { %v1334_v13 = vadd.f32 %v1318_v19, %v1281_v5  ;;  %4448 = vst [vmem:[#allocation25_spill] sm:$0xff] %v3501_v31  ;;  %v1335_v51 = vadd.f32 %v1319_v53, %v1282_v32  ;;  %v1336_v35 = vadd.f32 %v1320_v48, %v1283_v49  ;;  %v1337_v55 = vadd.f32 %v1321_v20, %v1284_v16  ;;  %v3510_v60 = vld [vmem:[%s2722_s17 + $0x131] sm:$0xff]  ;;  %v3514_v7 = vld [vmem:[%s2722_s17 + $0x161] sm:$0xff] }
  0xca   : > { %4449 = vst [vmem:[#allocation26_spill] sm:$0xff] %v3504_v30  ;;  %4450 = vst [vmem:[#allocation28_spill] sm:$0xff] %v3507_v38  ;;  %v1358_v61 = vmul.f32 %v2326_v37, %v3303_v28  ;;  %v1359_v17 = vmul.f32 %v3485_v42, %v3303_v28  ;;  %v1360_v1 = vmul.f32 %v3488_v52, %v3303_v28  ;;  %v4453_v49 = vld [vmem:[#allocation15_spill] sm:$0xff]  ;;  %v4454_v46 = vld [vmem:[#allocation48_spill] sm:$0xff] }
  0xcb   : > { %4451 = vst [vmem:[#allocation29_spill] sm:$0xff] %v3510_v60  ;;  %4452 = vst [vmem:[#allocation30_spill] sm:$0xff] %v3514_v7  ;;  %v1361_v5 = vmul.f32 %v3491_v54, %v3303_v28  ;;  %v1362_v32 = vmul.f32 %v3494_v6, %v3303_v28  ;;  %v1363_v16 = vmul.f32 %v4453_v49, %v3303_v28  ;;  %v4455_v48 = vld [vmem:[#allocation16_spill] sm:$0xff]  ;;  %v4456_v54 = vld [vmem:[#allocation13_spill] sm:$0xff] }
  0xcc   : > { %v1364_v23 = vmul.f32 %v4454_v46, %v3303_v28  ;;  %v1365_v29 = vmul.f32 %v3497_v36, %v3303_v28  ;;  %v1366_v50 = vmul.f32 %v2334_v14, %v3303_v28  ;;  %v1367_v26 = vmul.f32 %v3501_v31, %v3303_v28 }
  0xcd   : > { %v1368_v34 = vmul.f32 %v3504_v30, %v3303_v28  ;;  %v1369_v19 = vmul.f32 %v3507_v38, %v3303_v28  ;;  %v1370_v53 = vmul.f32 %v3510_v60, %v3303_v28  ;;  %v1371_v20 = vmul.f32 %v4455_v48, %v3303_v28  ;;  %v518_v38 = vld [vmem:[%s2717_s21 + $0x20] sm:$0x1f] }
  0xce   : > { %v1372_v37 = vmul.f32 %v3306_v27, %v3303_v28  ;;  %v1373_v14 = vmul.f32 %v3514_v7, %v3303_v28  ;;  %v1374_v49 = vadd.f32 %v1358_v61, %v1322_v25  ;;  %v1375_v31 = vadd.f32 %v1359_v17, %v1323_v4  ;;  %v4457_v27 = vld [vmem:[#allocation41_spill] sm:$0xff]  ;;  %v3556_v17 = vld [vmem:[%s2722_s17 + $0x62] sm:$0xff] }
  0xcf   : > { %v1376_v30 = vadd.f32 %v1360_v1, %v1324_v15  ;;  %v1377_v36 = vadd.f32 %v1361_v5, %v1325_v8  ;;  %v1378_v46 = vadd.f32 %v1362_v32, %v1326_v47  ;;  %v1379_v60 = vadd.f32 %v1363_v16, %v1327_v2  ;;  %v2342_v15 = vld [vmem:[%s2722_s17 + $0x32] sm:$0xff]  ;;  %v3550_v8 = vld [vmem:[%s2722_s17 + $0x42] sm:$0xff]  ;;  %4460 = vst [vmem:[#allocation33_spill] sm:$0xff] %v3556_v17 }
  0xd0   : > { %v1380_v6 = vadd.f32 %v1364_v23, %v1328_v0  ;;  %v1381_v48 = vadd.f32 %v1365_v29, %v1329_v59  ;;  %v1409_v52 = vrot.slane %v4457_v27, %v4456_v54  ;;  %v1382_v28 = vadd.f32 %v1366_v50, %v1330_v56  ;;  %4458 = vst [vmem:[#allocation31_spill] sm:$0xff] %v3550_v8  ;;  %v3553_v59 = vld [vmem:[%s2722_s17 + $0x52] sm:$0xff]  ;;  %v3562_v56 = vld [vmem:[%s2722_s17 + $0xa2] sm:$0xff] }
  0xd1   : > { %v1383_v7 = vadd.f32 %v1367_v26, %v1331_v62  ;;  %v1384_v25 = vadd.f32 %v1368_v34, %v1332_v44  ;;  %v1385_v4 = vadd.f32 %v1369_v19, %v1333_v40  ;;  %v1386_v47 = vadd.f32 %v1370_v53, %v1334_v13  ;;  %4459 = vst [vmem:[#allocation32_spill] sm:$0xff] %v3553_v59  ;;  %v3559_v1 = vld [vmem:[%s2722_s17 + $0x72] sm:$0xff]  ;;  %v3566_v44 = vld [vmem:[%s2722_s17 + $0x102] sm:$0xff] }
  0xd2   : > { %v1387_v2 = vadd.f32 %v1371_v20, %v1335_v51  ;;  %v1388_v0 = vadd.f32 %v1372_v37, %v1336_v35  ;;  %v1389_v61 = vadd.f32 %v1373_v14, %v1337_v55  ;;  %4461 = vst [vmem:[#allocation35_spill] sm:$0xff] %v3559_v1  ;;  %4462 = vst [vmem:[#allocation36_spill] sm:$0xff] %v3562_v56  ;;  %v2350_v62 = vld [vmem:[%s2722_s17 + $0xf2] sm:$0xff]  ;;  %v3586_v29 = vld [vmem:[%s2722_s17 + $0x122] sm:$0xff] }
  0xd3   : > { %4463 = vst [vmem:[#allocation37_spill] sm:$0xff] %v3566_v44  ;;  %v4464_v40 = vld [vmem:[#allocation17_spill] sm:$0xff]  ;;  %v4465_v13 = vld [vmem:[#allocation18_spill] sm:$0xff]  ;;  %4470 = vst [vmem:[#allocation40_spill] sm:$0xff] %v3586_v29  ;;  %v1410_v26 = vmul.f32 %v2342_v15, %v1409_v52  ;;  %v3592_v34 = vrot.slane %v518_v38, %v4456_v54  ;;  %v1411_v20 = vmul.f32 %v3550_v8, %v1409_v52 }
  0xd4   : > { %v3570_v5 = vrot.slane %v4457_v27, %v4464_v40  ;;  %v3574_v51 = vrot.slane %v4457_v27, %v4465_v13  ;;  %v4466_v35 = vld [vmem:[#allocation5_spill] sm:$0xff]  ;;  %v4467_v32 = vld [vmem:[#allocation6_spill] sm:$0xff]  ;;  %v3595_v19 = vrot.slane %v518_v38, %v4464_v40  ;;  %v3598_v27 = vrot.slane %v518_v38, %v4465_v13  ;;  %v3601_v53 = vld [vmem:[%s2722_s17 + $0x162] sm:$0xff] }
  0xd5   : > { %v3577_v55 = vrot.slane %v518_v38, %v4466_v35  ;;  %v3580_v16 = vrot.slane %v518_v38, %v4467_v32  ;;  %v3583_v23 = vld [vmem:[%s2722_s17 + $0x112] sm:$0xff]  ;;  %4472 = vst [vmem:[#allocation42_spill] sm:$0xff] %v3592_v34  ;;  %v1412_v37 = vmul.f32 %v3553_v59, %v1409_v52  ;;  %v1413_v14 = vmul.f32 %v3556_v17, %v1409_v52  ;;  %v4476_v59 = vld [vmem:[#allocation7_spill] sm:$0xff] }
  0xd6   : > { %4469 = vst [vmem:[#allocation39_spill] sm:$0xff] %v3583_v23  ;;  %v3589_v50 = vld [vmem:[%s2722_s17 + $0x132] sm:$0xff]  ;;  %4473 = vst [vmem:[#allocation43_spill] sm:$0xff] %v3595_v19  ;;  %v1414_v32 = vmul.f32 %v3559_v1, %v1409_v52  ;;  %v1415_v15 = vmul.f32 %v4405_v33, %v1409_v52  ;;  %v1417_v40 = vmul.f32 %v3562_v56, %v1409_v52  ;;  %v3619_v34 = vld [vmem:[%s2722_s17 + $0x43] sm:$0xff] }
  0xd7   : > { %4468 = vst [vmem:[#allocation38_spill] sm:$0xff] %v3580_v16  ;;  %4471 = vst [vmem:[#allocation20_spill] sm:$0xff] %v3589_v50  ;;  %v4475_v54 = vld [vmem:[#allocation62_spill] sm:$0xff]  ;;  %v1418_v38 = vmul.f32 %v2350_v62, %v1409_v52  ;;  %v1419_v13 = vmul.f32 %v3566_v44, %v1409_v52  ;;  %v1421_v19 = vmul.f32 %v3586_v29, %v1409_v52 }
  0xd8   : > { %4474 = vst [vmem:[#allocation44_spill] sm:$0xff] %v3598_v27  ;;  %v1416_v35 = vmul.f32 %v4475_v54, %v1409_v52  ;;  %v1420_v27 = vmul.f32 %v3583_v23, %v1409_v52  ;;  %v1422_v17 = vmul.f32 %v3589_v50, %v1409_v52  ;;  %v1423_v1 = vmul.f32 %v4476_v59, %v1409_v52  ;;  %v2358_v29 = vld [vmem:[%s2722_s17 + $0x33] sm:$0xff] }
  0xd9   : > { %v1424_v33 = vmul.f32 %v3328_v63, %v1409_v52  ;;  %v1425_v54 = vmul.f32 %v3601_v53, %v1409_v52  ;;  %v1426_v8 = vadd.f32 %v1410_v26, %v1374_v49  ;;  %v1427_v56 = vadd.f32 %v1411_v20, %v1375_v31  ;;  %v3622_v63 = vld [vmem:[%s2722_s17 + $0x53] sm:$0xff]  ;;  %v3625_v52 = vld [vmem:[%s2722_s17 + $0x63] sm:$0xff] }
  0xda   : > { %v1428_v62 = vadd.f32 %v1412_v37, %v1376_v30  ;;  %v1429_v44 = vadd.f32 %v1413_v14, %v1377_v36  ;;  %v1430_v23 = vadd.f32 %v1414_v32, %v1378_v46  ;;  %v1431_v50 = vadd.f32 %v1415_v15, %v1379_v60  ;;  %4477 = vst [vmem:[#allocation45_spill] sm:$0xff] %v3625_v52  ;;  %v3628_v31 = vld [vmem:[%s2722_s17 + $0x73] sm:$0xff]  ;;  %v3631_v26 = vld [vmem:[%s2722_s17 + $0xa3] sm:$0xff] }
  0xdb   : > { %v1432_v42 = vadd.f32 %v1416_v35, %v1380_v6  ;;  %v1433_v59 = vadd.f32 %v1417_v40, %v1381_v48  ;;  %v1434_v16 = vadd.f32 %v1418_v38, %v1382_v28  ;;  %4478 = vst [vmem:[#allocation46_spill] sm:$0xff] %v3628_v31  ;;  %v1435_v36 = vadd.f32 %v1419_v13, %v1383_v7  ;;  %v2366_v60 = vld [vmem:[%s2722_s17 + $0xf3] sm:$0xff]  ;;  %v3635_v6 = vld [vmem:[%s2722_s17 + $0x103] sm:$0xff] }
  0xdc   : > { %v1436_v30 = vadd.f32 %v1420_v27, %v1384_v25  ;;  %v1437_v46 = vadd.f32 %v1421_v19, %v1385_v4  ;;  %v1438_v49 = vadd.f32 %v1422_v17, %v1386_v47  ;;  %4479 = vst [vmem:[#allocation47_spill] sm:$0xff] %v3631_v26  ;;  %4480 = vst [vmem:[#allocation49_spill] sm:$0xff] %v3635_v6  ;;  %v3638_v20 = vld [vmem:[%s2722_s17 + $0x113] sm:$0xff]  ;;  %v3641_v37 = vld [vmem:[%s2722_s17 + $0x123] sm:$0xff] }
  0xdd   : > { %v1439_v48 = vadd.f32 %v1423_v1, %v1387_v2  ;;  %v1440_v35 = vadd.f32 %v1424_v33, %v1388_v0  ;;  %v1441_v28 = vadd.f32 %v1425_v54, %v1389_v61  ;;  %4481 = vst [vmem:[#allocation50_spill] sm:$0xff] %v3638_v20  ;;  %4482 = vst [vmem:[#allocation51_spill] sm:$0xff] %v3641_v37  ;;  %v3644_v14 = vld [vmem:[%s2722_s17 + $0x133] sm:$0xff]  ;;  %v3648_v7 = vld [vmem:[%s2722_s17 + $0x163] sm:$0xff] }
  0xde   : > { %4483 = vst [vmem:[#allocation52_spill] sm:$0xff] %v3644_v14  ;;  %v1462_v32 = vmul.f32 %v2358_v29, %v3570_v5  ;;  %4484 = vst [vmem:[#allocation53_spill] sm:$0xff] %v3648_v7  ;;  %v1463_v25 = vmul.f32 %v3619_v34, %v3570_v5  ;;  %v1464_v4 = vmul.f32 %v3622_v63, %v3570_v5  ;;  %v4485_v61 = vld [vmem:[#allocation69_spill] sm:$0xff] }
  0xdf   : > { %v1465_v47 = vmul.f32 %v3625_v52, %v3570_v5  ;;  %v1466_v2 = vmul.f32 %v3628_v31, %v3570_v5  ;;  %v1467_v0 = vmul.f32 %v4420_v57, %v3570_v5  ;;  %v1468_v17 = vmul.f32 %v4485_v61, %v3570_v5  ;;  %v4486_v54 = vld [vmem:[#allocation9_spill] sm:$0xff] }
  0xe0   : > { %v1469_v1 = vmul.f32 %v3631_v26, %v3570_v5  ;;  %v1470_v29 = vmul.f32 %v2366_v60, %v3570_v5  ;;  %v1471_v19 = vmul.f32 %v3635_v6, %v3570_v5  ;;  %v1472_v27 = vmul.f32 %v3638_v20, %v3570_v5  ;;  %v3681_v26 = vld [vmem:[%s2722_s17 + $0x44] sm:$0xff]  ;;  %v3684_v52 = vld [vmem:[%s2722_s17 + $0x54] sm:$0xff] }
  0xe1   : > { %v1473_v15 = vmul.f32 %v3641_v37, %v3570_v5  ;;  %v1474_v57 = vmul.f32 %v3644_v14, %v3570_v5  ;;  %v1475_v40 = vmul.f32 %v4486_v54, %v3570_v5  ;;  %v1476_v38 = vmul.f32 %v3351_v22, %v3570_v5  ;;  %v2374_v14 = vld [vmem:[%s2722_s17 + $0x34] sm:$0xff]  ;;  %4487 = vst [vmem:[#allocation54_spill] sm:$0xff] %v3681_v26 }
  0xe2   : > { %v1477_v13 = vmul.f32 %v3648_v7, %v3570_v5  ;;  %v1478_v33 = vadd.f32 %v1462_v32, %v1426_v8  ;;  %v1479_v60 = vadd.f32 %v1463_v25, %v1427_v56  ;;  %v1480_v20 = vadd.f32 %v1464_v4, %v1428_v62  ;;  %4488 = vst [vmem:[#allocation34_spill] sm:$0xff] %v3684_v52  ;;  %v3687_v8 = vld [vmem:[%s2722_s17 + $0x64] sm:$0xff]  ;;  %v3690_v56 = vld [vmem:[%s2722_s17 + $0x74] sm:$0xff] }
  0xe3   : > { %v1481_v37 = vadd.f32 %v1465_v47, %v1429_v44  ;;  %v1482_v6 = vadd.f32 %v1466_v2, %v1430_v23  ;;  %v1483_v61 = vadd.f32 %v1467_v0, %v1431_v50  ;;  %v1484_v54 = vadd.f32 %v1468_v17, %v1432_v42  ;;  %4489 = vst [vmem:[#allocation56_spill] sm:$0xff] %v3687_v8  ;;  %v3693_v32 = vld [vmem:[%s2722_s17 + $0xa4] sm:$0xff]  ;;  %v2382_v50 = vld [vmem:[%s2722_s17 + $0xf4] sm:$0xff] }
  0xe4   : > { %v1485_v31 = vadd.f32 %v1469_v1, %v1433_v59  ;;  %v1486_v22 = vadd.f32 %v1470_v29, %v1434_v16  ;;  %4490 = vst [vmem:[#allocation57_spill] sm:$0xff] %v3690_v56  ;;  %v1487_v44 = vadd.f32 %v1471_v19, %v1435_v36  ;;  %v1488_v5 = vadd.f32 %v1472_v27, %v1436_v30  ;;  %v3697_v42 = vld [vmem:[%s2722_s17 + $0x104] sm:$0xff]  ;;  %v3700_v4 = vld [vmem:[%s2722_s17 + $0x114] sm:$0xff] }
  0xe5   : > { %v1489_v23 = vadd.f32 %v1473_v15, %v1437_v46  ;;  %v1490_v62 = vadd.f32 %v1474_v57, %v1438_v49  ;;  %4491 = vst [vmem:[#allocation58_spill] sm:$0xff] %v3693_v32  ;;  %4492 = vst [vmem:[#allocation59_spill] sm:$0xff] %v3697_v42  ;;  %v1491_v59 = vadd.f32 %v1475_v40, %v1439_v48  ;;  %v3703_v47 = vld [vmem:[%s2722_s17 + $0x124] sm:$0xff]  ;;  %v3706_v2 = vld [vmem:[%s2722_s17 + $0x134] sm:$0xff] }
  0xe6   : > { %v1492_v25 = vadd.f32 %v1476_v38, %v1440_v35  ;;  %v1493_v16 = vadd.f32 %v1477_v13, %v1441_v28  ;;  %4493 = vst [vmem:[#allocation60_spill] sm:$0xff] %v3700_v4  ;;  %4494 = vst [vmem:[#allocation61_spill] sm:$0xff] %v3703_v47  ;;  %v1514_v0 = vmul.f32 %v2374_v14, %v3574_v51  ;;  %v3710_v36 = vld [vmem:[%s2722_s17 + $0x164] sm:$0xff] }
  0xe7   : > { %4495 = vst [vmem:[#allocation64_spill] sm:$0xff] %v3706_v2  ;;  %v1515_v30 = vmul.f32 %v3681_v26, %v3574_v51  ;;  %v1516_v46 = vmul.f32 %v3684_v52, %v3574_v51  ;;  %v1517_v49 = vmul.f32 %v3687_v8, %v3574_v51  ;;  %v1518_v48 = vmul.f32 %v3690_v56, %v3574_v51  ;;  %v2397_v52 = vld [vmem:[%s2722_s17 + $0xb0] sm:$0xff] }
  0xe8   : > { %v1519_v35 = vmul.f32 %v4434_v21, %v3574_v51  ;;  %v1520_v28 = vmul.f32 %v3384_v41, %v3574_v51  ;;  %v1521_v14 = vmul.f32 %v3693_v32, %v3574_v51  ;;  %v1522_v17 = vmul.f32 %v2382_v50, %v3574_v51 }
  0xe9   : > { %v1523_v1 = vmul.f32 %v3697_v42, %v3574_v51  ;;  %v1524_v29 = vmul.f32 %v3700_v4, %v3574_v51  ;;  %v1525_v19 = vmul.f32 %v3703_v47, %v3574_v51  ;;  %v1526_v21 = vmul.f32 %v3706_v2, %v3574_v51  ;;  %v2394_v42 = vld [vmem:[%s2722_s17 + $0x80] sm:$0xff] }
  0xea   : > { %v1527_v27 = vmul.f32 %v3210_v24, %v3574_v51  ;;  %v1528_v15 = vmul.f32 %v3389_v11, %v3574_v51  ;;  %v1529_v57 = vmul.f32 %v3710_v36, %v3574_v51  ;;  %v1530_v40 = vadd.f32 %v1514_v0, %v1478_v33  ;;  %v2402_v33 = vld [vmem:[%s2722_s17 + $0x140] sm:$0xff] }
  0xeb   : > { %v1531_v38 = vadd.f32 %v1515_v30, %v1479_v60  ;;  %v1532_v13 = vadd.f32 %v1516_v46, %v1480_v20  ;;  %v1533_v50 = vadd.f32 %v1517_v49, %v1481_v37  ;;  %v1534_v32 = vadd.f32 %v1518_v48, %v1482_v6  ;;  %v2405_v37 = vld [vmem:[%s2722_s17 + $0x170] sm:$0xff]  ;;  %v2410_v48 = vld [vmem:[%s2722_s17 + $0x81] sm:$0xff] }
  0xec   : > { %v1535_v41 = vadd.f32 %v1519_v35, %v1483_v61  ;;  %v1536_v47 = vadd.f32 %v1520_v28, %v1484_v54  ;;  %v1537_v2 = vadd.f32 %v1521_v14, %v1485_v31  ;;  %v1538_v4 = vadd.f32 %v1522_v17, %v1486_v22 }
  0xed   : > { %v1539_v24 = vadd.f32 %v1523_v1, %v1487_v44  ;;  %v1540_v56 = vadd.f32 %v1524_v29, %v1488_v5  ;;  %v1541_v8 = vadd.f32 %v1525_v19, %v1489_v23  ;;  %v1542_v11 = vadd.f32 %v1526_v21, %v1490_v62  ;;  %v4497_v5 = vld [vmem:[#allocation27_spill] sm:$0xff]  ;;  %v4498_v62 = vld [vmem:[#allocation10_spill] sm:$0xff] }
  0xee   : > { %v1543_v26 = vadd.f32 %v1527_v27, %v1491_v59  ;;  %v1544_v7 = vadd.f32 %v1528_v15, %v1492_v25  ;;  %v1545_v51 = vadd.f32 %v1529_v57, %v1493_v16  ;;  %v1567_v20 = vmul.f32 %v3423_v58, %v3577_v55  ;;  %v2418_v19 = vld [vmem:[%s2722_s17 + $0x141] sm:$0xff]  ;;  %v4499_v21 = vld [vmem:[#allocation38_spill] sm:$0xff] }
  0xef   : > { %v1568_v6 = vmul.f32 %v3426_v3, %v3577_v55  ;;  %v1569_v22 = vmul.f32 %v3429_v18, %v3577_v55  ;;  %v1570_v31 = vmul.f32 %v3432_v43, %v3577_v55  ;;  %v1571_v61 = vmul.f32 %v2394_v42, %v3577_v55  ;;  %v4496_v18 = vld [vmem:[#allocation14_spill] sm:$0xff]  ;;  %v4500_v27 = vld [vmem:[#allocation8_spill] sm:$0xff] }
  0xf0   : > { %v1572_v60 = vmul.f32 %v3243_v39, %v3577_v55  ;;  %v1573_v54 = vmul.f32 %v3435_v10, %v3577_v55  ;;  %v1574_v58 = vmul.f32 %v2397_v52, %v3577_v55  ;;  %v1575_v44 = vmul.f32 %v3439_v12, %v3577_v55  ;;  %v2421_v57 = vld [vmem:[%s2722_s17 + $0x171] sm:$0xff] }
  0xf1   : > { %v1576_v3 = vmul.f32 %v3442_v9, %v3577_v55  ;;  %v1577_v43 = vmul.f32 %v4496_v18, %v3577_v55  ;;  %v1578_v23 = vmul.f32 %v4497_v5, %v3577_v55  ;;  %v1579_v39 = vmul.f32 %v2402_v33, %v3577_v55  ;;  %v4508_v33 = vld [vmem:[#allocation28_spill] sm:$0xff] }
  0xf2   : > { %v1580_v10 = vmul.f32 %v4498_v62, %v3577_v55  ;;  %v1581_v52 = vmul.f32 %v3452_v45, %v3577_v55  ;;  %v1582_v12 = vmul.f32 %v2405_v37, %v3577_v55  ;;  %v1583_v42 = vadd.f32 %v1567_v20, %v1530_v40  ;;  %v2413_v45 = vld [vmem:[%s2722_s17 + $0xb1] sm:$0xff] }
  0xf3   : > { %v1584_v9 = vadd.f32 %v1568_v6, %v1531_v38  ;;  %v1585_v59 = vadd.f32 %v1569_v22, %v1532_v13  ;;  %v1586_v25 = vadd.f32 %v1570_v31, %v1533_v50  ;;  %v1587_v16 = vadd.f32 %v1571_v61, %v1534_v32  ;;  %v4501_v32 = vld [vmem:[#allocation21_spill] sm:$0xff]  ;;  %v4510_v31 = vld [vmem:[#allocation55_spill] sm:$0xff] }
  0xf4   : > { %v1588_v0 = vadd.f32 %v1572_v60, %v1535_v41  ;;  %v1589_v30 = vadd.f32 %v1573_v54, %v1536_v47  ;;  %v1590_v46 = vadd.f32 %v1574_v58, %v1537_v2  ;;  %v1591_v49 = vadd.f32 %v1575_v44, %v1538_v4  ;;  %v4502_v47 = vld [vmem:[#allocation22_spill] sm:$0xff]  ;;  %v4503_v2 = vld [vmem:[#allocation23_spill] sm:$0xff]  ;;  %v4506_v13 = vld [vmem:[#allocation25_spill] sm:$0xff] }
  0xf5   : > { %v1592_v35 = vadd.f32 %v1576_v3, %v1539_v24  ;;  %v1593_v28 = vadd.f32 %v1577_v43, %v1540_v56  ;;  %v1594_v14 = vadd.f32 %v1578_v23, %v1541_v8  ;;  %v1595_v17 = vadd.f32 %v1579_v39, %v1542_v11  ;;  %v4505_v8 = vld [vmem:[#allocation24_spill] sm:$0xff]  ;;  %v4507_v24 = vld [vmem:[#allocation26_spill] sm:$0xff]  ;;  %v4509_v37 = vld [vmem:[#allocation29_spill] sm:$0xff] }
  0xf6   : > { %v1596_v1 = vadd.f32 %v1580_v10, %v1543_v26  ;;  %v1597_v29 = vadd.f32 %v1581_v52, %v1544_v7  ;;  %v1598_v55 = vadd.f32 %v1582_v12, %v1545_v51  ;;  %v1619_v15 = vmul.f32 %v4500_v27, %v4499_v21  ;;  %v4504_v26 = vld [vmem:[#allocation48_spill] sm:$0xff]  ;;  %v4511_v60 = vld [vmem:[#allocation30_spill] sm:$0xff] }
  0xf7   : > { %v1620_v41 = vmul.f32 %v4501_v32, %v4499_v21  ;;  %v1621_v4 = vmul.f32 %v4502_v47, %v4499_v21  ;;  %v1622_v56 = vmul.f32 %v4503_v2, %v4499_v21  ;;  %v1623_v11 = vmul.f32 %v2410_v48, %v4499_v21  ;;  %v2426_v52 = vld [vmem:[%s2722_s17 + $0x82] sm:$0xff]  ;;  %v2429_v27 = vld [vmem:[%s2722_s17 + $0xb2] sm:$0xff] }
  0xf8   : > { %v1624_v7 = vmul.f32 %v4504_v26, %v4499_v21  ;;  %v1625_v40 = vmul.f32 %v4505_v8, %v4499_v21  ;;  %v1626_v38 = vmul.f32 %v2413_v45, %v4499_v21  ;;  %v1627_v50 = vmul.f32 %v4506_v13, %v4499_v21  ;;  %v4522_v26 = vld [vmem:[#allocation20_spill] sm:$0xff] }
  0xf9   : > { %v1628_v51 = vmul.f32 %v4507_v24, %v4499_v21  ;;  %v1629_v20 = vmul.f32 %v4508_v33, %v4499_v21  ;;  %v1630_v6 = vmul.f32 %v4509_v37, %v4499_v21  ;;  %v1631_v22 = vmul.f32 %v2418_v19, %v4499_v21 }
  0xfa   : > { %v1632_v61 = vmul.f32 %v4510_v31, %v4499_v21  ;;  %v1633_v54 = vmul.f32 %v4511_v60, %v4499_v21  ;;  %v1634_v58 = vmul.f32 %v2421_v57, %v4499_v21  ;;  %v1635_v44 = vadd.f32 %v1619_v15, %v1583_v42  ;;  %v2434_v42 = vld [vmem:[%s2722_s17 + $0x142] sm:$0xff]  ;;  %v4519_v57 = vld [vmem:[#allocation37_spill] sm:$0xff] }
  0xfb   : > { %v1636_v3 = vadd.f32 %v1620_v41, %v1584_v9  ;;  %v1637_v18 = vadd.f32 %v1621_v4, %v1585_v59  ;;  %v1638_v43 = vadd.f32 %v1622_v56, %v1586_v25  ;;  %v1639_v5 = vadd.f32 %v1623_v11, %v1587_v16  ;;  %v4512_v9 = vld [vmem:[#allocation42_spill] sm:$0xff]  ;;  %v4513_v59 = vld [vmem:[#allocation31_spill] sm:$0xff]  ;;  %v4514_v16 = vld [vmem:[#allocation32_spill] sm:$0xff] }
  0xfc   : > { %v1640_v23 = vadd.f32 %v1624_v7, %v1588_v0  ;;  %v1641_v39 = vadd.f32 %v1625_v40, %v1589_v30  ;;  %v1642_v62 = vadd.f32 %v1626_v38, %v1590_v46  ;;  %v1643_v10 = vadd.f32 %v1627_v50, %v1591_v49  ;;  %v2437_v25 = vld [vmem:[%s2722_s17 + $0x172] sm:$0xff]  ;;  %v4516_v49 = vld [vmem:[#allocation35_spill] sm:$0xff]  ;;  %v4521_v56 = vld [vmem:[#allocation40_spill] sm:$0xff] }
  0xfd   : > { %v1644_v12 = vadd.f32 %v1628_v51, %v1592_v35  ;;  %v1645_v48 = vadd.f32 %v1629_v20, %v1593_v28  ;;  %v1646_v45 = vadd.f32 %v1630_v6, %v1594_v14  ;;  %v1647_v19 = vadd.f32 %v1631_v22, %v1595_v17  ;;  %v4515_v30 = vld [vmem:[#allocation33_spill] sm:$0xff]  ;;  %v4517_v14 = vld [vmem:[#allocation62_spill] sm:$0xff]  ;;  %v4520_v4 = vld [vmem:[#allocation39_spill] sm:$0xff] }
  0xfe   : > { %v1648_v32 = vadd.f32 %v1632_v61, %v1596_v1  ;;  %v1649_v47 = vadd.f32 %v1633_v54, %v1597_v29  ;;  %v1650_v21 = vadd.f32 %v1634_v58, %v1598_v55  ;;  %v1671_v15 = vmul.f32 %v4513_v59, %v4512_v9  ;;  %v4518_v1 = vld [vmem:[#allocation36_spill] sm:$0xff]  ;;  %v4523_v40 = vld [vmem:[#allocation63_spill] sm:$0xff]  ;;  %v4530_v59 = vld [vmem:[#allocation50_spill] sm:$0xff] }
  0xff   : > { %v1672_v0 = vmul.f32 %v4514_v16, %v4512_v9  ;;  %v1673_v46 = vmul.f32 %v4515_v30, %v4512_v9  ;;  %v1674_v35 = vmul.f32 %v4516_v49, %v4512_v9  ;;  %v1675_v28 = vmul.f32 %v2426_v52, %v4512_v9  ;;  %v2442_v60 = vld [vmem:[%s2722_s17 + $0x83] sm:$0xff] }
 0x100   : > { %v1676_v17 = vmul.f32 %v4517_v14, %v4512_v9  ;;  %v1677_v29 = vmul.f32 %v4518_v1, %v4512_v9  ;;  %v1678_v55 = vmul.f32 %v2429_v27, %v4512_v9  ;;  %v1679_v41 = vmul.f32 %v4519_v57, %v4512_v9  ;;  %v2445_v27 = vld [vmem:[%s2722_s17 + $0xb3] sm:$0xff]  ;;  %v4533_v49 = vld [vmem:[#allocation11_spill] sm:$0xff] }
 0x101   : > { %v1680_v2 = vmul.f32 %v4520_v4, %v4512_v9  ;;  %v1681_v11 = vmul.f32 %v4521_v56, %v4512_v9  ;;  %v1682_v7 = vmul.f32 %v4522_v26, %v4512_v9  ;;  %v1683_v8 = vmul.f32 %v2434_v42, %v4512_v9  ;;  %v4535_v56 = vld [vmem:[#allocation44_spill] sm:$0xff] }
 0x102   : > { %v1684_v38 = vmul.f32 %v4523_v40, %v4512_v9  ;;  %v1685_v13 = vmul.f32 %v3601_v53, %v4512_v9  ;;  %v1686_v50 = vmul.f32 %v2437_v25, %v4512_v9  ;;  %v1687_v24 = vadd.f32 %v1671_v15, %v1635_v44  ;;  %v4531_v25 = vld [vmem:[#allocation51_spill] sm:$0xff]  ;;  %v4538_v40 = vld [vmem:[#allocation56_spill] sm:$0xff] }
 0x103   : > { %v1688_v51 = vadd.f32 %v1672_v0, %v1636_v3  ;;  %v1689_v33 = vadd.f32 %v1673_v46, %v1637_v18  ;;  %v1690_v20 = vadd.f32 %v1674_v35, %v1638_v43  ;;  %v1691_v37 = vadd.f32 %v1675_v28, %v1639_v5  ;;  %v2450_v3 = vld [vmem:[%s2722_s17 + $0x143] sm:$0xff]  ;;  %v2453_v5 = vld [vmem:[%s2722_s17 + $0x173] sm:$0xff] }
 0x104   : > { %v1692_v6 = vadd.f32 %v1676_v17, %v1640_v23  ;;  %v1693_v22 = vadd.f32 %v1677_v29, %v1641_v39  ;;  %v3837_v31 = vadd.f32 %v1678_v55, %v1642_v62  ;;  %v1695_v61 = vadd.f32 %v1679_v41, %v1643_v10  ;;  %v4524_v18 = vld [vmem:[#allocation43_spill] sm:$0xff]  ;;  %v4525_v39 = vld [vmem:[#allocation45_spill] sm:$0xff]  ;;  %v4526_v10 = vld [vmem:[#allocation46_spill] sm:$0xff] }
 0x105   : > { %v1696_v54 = vadd.f32 %v1680_v2, %v1644_v12  ;;  %v1697_v58 = vadd.f32 %v1681_v11, %v1645_v48  ;;  %v1698_v52 = vadd.f32 %v1682_v7, %v1646_v45  ;;  %v1699_v53 = vadd.f32 %v1683_v8, %v1647_v19  ;;  %v4527_v45 = vld [vmem:[#allocation69_spill] sm:$0xff]  ;;  %v4532_v0 = vld [vmem:[#allocation52_spill] sm:$0xff]  ;;  %v4536_v11 = vld [vmem:[#allocation54_spill] sm:$0xff] }
 0x106   : > { %v1700_v42 = vadd.f32 %v1684_v38, %v1648_v32  ;;  %v1701_v9 = vadd.f32 %v1685_v13, %v1649_v47  ;;  %v3841_v44 = vadd.f32 %v1686_v50, %v1650_v21  ;;  %v1723_v43 = vmul.f32 %v3619_v34, %v4524_v18  ;;  %v4528_v32 = vld [vmem:[#allocation47_spill] sm:$0xff]  ;;  %v4529_v21 = vld [vmem:[#allocation49_spill] sm:$0xff]  ;;  %v4537_v7 = vld [vmem:[#allocation34_spill] sm:$0xff] }
 0x107   : > { %v1724_v23 = vmul.f32 %v3622_v63, %v4524_v18  ;;  %v1725_v62 = vmul.f32 %v4525_v39, %v4524_v18  ;;  %v1726_v12 = vmul.f32 %v4526_v10, %v4524_v18  ;;  %v1727_v48 = vmul.f32 %v2442_v60, %v4524_v18  ;;  %v4534_v28 = vld [vmem:[#allocation53_spill] sm:$0xff]  ;;  %v2458_v2 = vld [vmem:[%s2722_s17 + $0x84] sm:$0xff] }
 0x108   : > { %v1728_v19 = vmul.f32 %v4527_v45, %v4524_v18  ;;  %v1729_v47 = vmul.f32 %v4528_v32, %v4524_v18  ;;  %v1730_v34 = vmul.f32 %v2445_v27, %v4524_v18  ;;  %v1731_v63 = vmul.f32 %v4529_v21, %v4524_v18  ;;  %v2466_v27 = vld [vmem:[%s2722_s17 + $0x144] sm:$0xff] }
 0x109   : > { %v1732_v15 = vmul.f32 %v4530_v59, %v4524_v18  ;;  %v1733_v16 = vmul.f32 %v4531_v25, %v4524_v18  ;;  %v1734_v30 = vmul.f32 %v4532_v0, %v4524_v18  ;;  %v1735_v46 = vmul.f32 %v2450_v3, %v4524_v18  ;;  %v4542_v3 = vld [vmem:[#allocation61_spill] sm:$0xff]  ;;  %v4544_v45 = vld [vmem:[#allocation12_spill] sm:$0xff] }
 0x10a   : > { %v1736_v35 = vmul.f32 %v4533_v49, %v4524_v18  ;;  %v1737_v14 = vmul.f32 %v4534_v28, %v4524_v18  ;;  %v1738_v17 = vmul.f32 %v2453_v5, %v4524_v18  ;;  %v1739_v1 = vadd.f32 %v1723_v43, %v1687_v24  ;;  %v4539_v24 = vld [vmem:[#allocation57_spill] sm:$0xff]  ;;  %v4543_v43 = vld [vmem:[#allocation64_spill] sm:$0xff] }
 0x10b   : > { %v1740_v29 = vadd.f32 %v1724_v23, %v1688_v51  ;;  %v1741_v55 = vadd.f32 %v1725_v62, %v1689_v33  ;;  %v1742_v57 = vadd.f32 %v1726_v12, %v1690_v20  ;;  %v1743_v41 = vadd.f32 %v1727_v48, %v1691_v37  ;;  %v4540_v33 = vld [vmem:[#allocation59_spill] sm:$0xff]  ;;  %v4541_v37 = vld [vmem:[#allocation60_spill] sm:$0xff]  ;;  %v2469_v25 = vld [vmem:[%s2722_s17 + $0x174] sm:$0xff] }
 0x10c   : > { %v1747_v4 = vadd.f32 %v1731_v63, %v1695_v61  ;;  %v1775_v26 = vmul.f32 %v4536_v11, %v4535_v56  ;;  %v1776_v8 = vmul.f32 %v4537_v7, %v4535_v56  ;;  %v1777_v38 = vmul.f32 %v4538_v40, %v4535_v56  ;;  %v4545_v21 = vld [vmem:[#allocation76_spill] sm:$0xff] }
 0x10d   : > { %v1748_v13 = vadd.f32 %v1732_v15, %v1696_v54  ;;  %v1749_v50 = vadd.f32 %v1733_v16, %v1697_v58  ;;  %v1750_v60 = vadd.f32 %v1734_v30, %v1698_v52  ;;  %v1778_v51 = vmul.f32 %v4539_v24, %v4535_v56  ;;  %v2461_v15 = vld [vmem:[%s2722_s17 + $0xb4] sm:$0xff] }
 0x10e   : > { %v1783_v20 = vmul.f32 %v4540_v33, %v4535_v56  ;;  %v1784_v61 = vmul.f32 %v4541_v37, %v4535_v56  ;;  %v1785_v18 = vmul.f32 %v4542_v3, %v4535_v56  ;;  %v1786_v54 = vmul.f32 %v4543_v43, %v4535_v56  ;;  %v4546_v16 = vld [vmem:[#allocation58_spill] sm:$0xff] }
 0x10f   : > { %v1744_v58 = vadd.f32 %v1728_v19, %v1692_v6  ;;  %v1745_v52 = vadd.f32 %v1729_v47, %v1693_v22  ;;  %v1751_v5 = vadd.f32 %v1735_v46, %v1699_v53  ;;  %v1779_v23 = vmul.f32 %v2458_v2, %v4535_v56 }
 0x110   : > { %v1787_v39 = vmul.f32 %v2466_v27, %v4535_v56  ;;  %v1791_v62 = vadd.f32 %v1775_v26, %v1739_v1  ;;  %v1792_v10 = vadd.f32 %v1776_v8, %v1740_v29  ;;  %v1793_v12 = vadd.f32 %v1777_v38, %v1741_v55 }
 0x111   : > { %v1752_v48 = vadd.f32 %v1736_v35, %v1700_v42  ;;  %v1780_v32 = vmul.f32 %v4544_v45, %v4535_v56  ;;  %v1788_v63 = vmul.f32 %v4545_v21, %v4535_v56  ;;  %v1794_v59 = vadd.f32 %v1778_v51, %v1742_v57 }
 0x112   : > { %v1799_v6 = vadd.f32 %v1783_v20, %v1747_v4  ;;  %v1800_v22 = vadd.f32 %v1784_v61, %v1748_v13  ;;  %v1801_v53 = vadd.f32 %v1785_v18, %v1749_v50  ;;  %v1802_v19 = vadd.f32 %v1786_v54, %v1750_v60 }
 0x113   : > { %v1753_v47 = vadd.f32 %v1737_v14, %v1701_v9  ;;  %v1781_v0 = vmul.f32 %v4546_v16, %v4535_v56  ;;  %v1789_v42 = vmul.f32 %v3710_v36, %v4535_v56  ;;  %v1795_v30 = vadd.f32 %v1779_v23, %v1743_v41 }
 0x114   : > { %v1803_v46 = vadd.f32 %v1787_v39, %v1751_v5  ;;  %v1807_v49 = vadd.f32 %v1799_v6, %v1791_v62  ;;  %v1808_v35 = vadd.f32 %v1800_v22, %v1792_v10  ;;  %v1809_v28 = vadd.f32 %v1801_v53, %v1793_v12 }
 0x115   : > { %v1746_v1 = vadd.f32 %v1730_v34, %v3837_v31  ;;  %v1754_v29 = vadd.f32 %v1738_v17, %v3841_v44  ;;  %v1782_v55 = vmul.f32 %v2461_v15, %v4535_v56  ;;  %v1790_v57 = vmul.f32 %v2469_v25, %v4535_v56 }
 0x116   : > { %v1796_v9 = vadd.f32 %v1780_v32, %v1744_v58  ;;  %v1804_v14 = vadd.f32 %v1788_v63, %v1752_v48  ;;  %v1810_v4 = vadd.f32 %v1802_v19, %v1794_v59  ;;  %v1815_v2 = vadd.f32 %v1808_v35, %v1807_v49 }
 0x117   : > { %v1797_v11 = vadd.f32 %v1781_v0, %v1745_v52  ;;  %v1805_v26 = vadd.f32 %v1789_v42, %v1753_v47  ;;  %v1811_v36 = vadd.f32 %v1803_v46, %v1795_v30  ;;  %v1798_v7 = vadd.f32 %v1782_v55, %v1746_v1 }
 0x118   : > { %v1816_v41 = vadd.f32 %v1815_v2, %v1809_v28  ;;  %v1806_v8 = vadd.f32 %v1790_v57, %v1754_v29  ;;  %v1812_v40 = vadd.f32 %v1804_v14, %v1796_v9 }
 0x119   : > { %v1813_v13 = vadd.f32 %v1805_v26, %v1797_v11 }
 0x11a   : > { %v1817_v38 = vadd.f32 %v1816_v41, %v1810_v4  ;;  %v1814_v34 = vadd.f32 %v1806_v8, %v1798_v7 }
 0x11c   : > { %v1818_v31 = vadd.f32 %v1817_v38, %v1811_v36 }
 0x11e   : > { %v1819_v44 = vadd.f32 %v1818_v31, %v1812_v40 }
 0x120   : > { %v1820_v17 = vadd.f32 %v1819_v44, %v1813_v13 }
 0x122   : > { %v1821_v50 = vadd.f32 %v1820_v17, %v1814_v34  ;;  %v1883_v17 = vld [vmem:[%s510_s26] sm:$0x1] }
 0x124   : > { %v1822_v60 = vrot.slane %v1821_v50, 4 }
 0x126   : > { %v1823_v56 = vadd.f32 %v1822_v60, %v1821_v50 }
 0x128   : > { %v1824_v27 = vrot.slane %v1823_v56, 2 }
 0x12a   : > { %v1825_v24 = vadd.f32 %v1824_v27, %v1823_v56  ;;  %v4547_v56 = vld [vmem:[#allocation5_spill] sm:$0xff] }
 0x12c   : > { %v1826_v51 = vrot.slane %v1825_v24, 1 }
 0x12e   : > { %v1827_v33 = vadd.f32 %v1826_v51, %v1825_v24 }
 0x130   : > { %v1828_v20 = vmul.f32 0.0078125, %v1827_v33 }
 0x132   : > { %v3907_v37 = vsub.f32 %v1791_v62, %v1828_v20  ;;  %v3909_v61 = vsub.f32 %v1792_v10, %v1828_v20  ;;  %v3911_v3 = vsub.f32 %v1793_v12, %v1828_v20  ;;  %v3913_v18 = vsub.f32 %v1794_v59, %v1828_v20 }
 0x133   : > { %v3915_v43 = vsub.f32 %v1799_v6, %v1828_v20  ;;  %v3917_v54 = vsub.f32 %v1800_v22, %v1828_v20  ;;  %v3919_v58 = vsub.f32 %v1801_v53, %v1828_v20  ;;  %v3921_v52 = vsub.f32 %v1802_v19, %v1828_v20 }
 0x134   : > { %v1833_v5 = vsub.f32 %v1795_v30, %v1828_v20  ;;  %v3923_v23 = vsub.f32 %v1803_v46, %v1828_v20  ;;  %v1845_v39 = vmul.f32 %v3907_v37, %v3907_v37  ;;  %v1846_v62 = vmul.f32 %v3909_v61, %v3909_v61 }
 0x135   : > { %v1847_v10 = vmul.f32 %v3911_v3, %v3911_v3  ;;  %v1834_v12 = vsub.f32 %v1796_v9, %v1828_v20  ;;  %v3931_v48 = vsub.f32 %v1804_v14, %v1828_v20  ;;  %v1848_v45 = vmul.f32 %v3913_v18, %v3913_v18 }
 0x136   : > { %v1853_v32 = vmul.f32 %v3915_v43, %v3915_v43  ;;  %v1854_v21 = vmul.f32 %v3917_v54, %v3917_v54  ;;  %v1855_v63 = vmul.f32 %v3919_v58, %v3919_v58  ;;  %v1856_v59 = vmul.f32 %v3921_v52, %v3921_v52 }
 0x137   : > { %v1835_v15 = vsub.f32 %v1797_v11, %v1828_v20  ;;  %v1843_v25 = vsub.f32 %v1805_v26, %v1828_v20  ;;  %v1849_v6 = vmul.f32 %v1833_v5, %v1833_v5  ;;  %v1857_v22 = vmul.f32 %v3923_v23, %v3923_v23 }
 0x138   : > { %v1861_v53 = vadd.f32 %v1853_v32, %v1845_v39  ;;  %v1862_v19 = vadd.f32 %v1854_v21, %v1846_v62  ;;  %v1863_v47 = vadd.f32 %v1855_v63, %v1847_v10  ;;  %v1836_v16 = vsub.f32 %v1798_v7, %v1828_v20  ;;  %v2470_v39 = vld [vmem:[%s513_s29] ss:$0 sm:$0xff] }
 0x139   : > { %v1844_v0 = vsub.f32 %v1806_v8, %v1828_v20  ;;  %v1850_v42 = vmul.f32 %v1834_v12, %v1834_v12  ;;  %v1858_v30 = vmul.f32 %v3931_v48, %v3931_v48  ;;  %v1864_v46 = vadd.f32 %v1856_v59, %v1848_v45 }
 0x13a   : > { %v1869_v49 = vadd.f32 %v1862_v19, %v1861_v53  ;;  %v1851_v35 = vmul.f32 %v1835_v15, %v1835_v15  ;;  %v1859_v28 = vmul.f32 %v1843_v25, %v1843_v25  ;;  %v1865_v1 = vadd.f32 %v1857_v22, %v1849_v6 }
 0x13b   : > { %v1852_v55 = vmul.f32 %v1836_v16, %v1836_v16  ;;  %v1860_v57 = vmul.f32 %v1844_v0, %v1844_v0  ;;  %v1866_v9 = vadd.f32 %v1858_v30, %v1850_v42 }
 0x13c   : > { %v1870_v29 = vadd.f32 %v1869_v49, %v1863_v47  ;;  %v1867_v4 = vadd.f32 %v1859_v28, %v1851_v35 }
 0x13d   : > { %v1868_v11 = vadd.f32 %v1860_v57, %v1852_v55 }
 0x13e   : > { %v1871_v14 = vadd.f32 %v1870_v29, %v1864_v46 }
 0x140   : > { %v1872_v2 = vadd.f32 %v1871_v14, %v1865_v1 }
 0x142   : > { %v1873_v26 = vadd.f32 %v1872_v2, %v1866_v9 }
 0x144   : > { %v1874_v36 = vadd.f32 %v1873_v26, %v1867_v4 }
 0x146   : > { %v1875_v41 = vadd.f32 %v1874_v36, %v1868_v11 }
 0x148   : > { %v1876_v7 = vrot.slane %v1875_v41, 4 }
 0x14a   : > { %v1877_v8 = vadd.f32 %v1876_v7, %v1875_v41 }
 0x14c   : > { %v1878_v40 = vrot.slane %v1877_v8, 2 }
 0x14e   : > { %v1879_v38 = vadd.f32 %v1878_v40, %v1877_v8 }
 0x150   : > { %v1880_v13 = vrot.slane %v1879_v38, 1 }
 0x152   : > { %v1881_v31 = vadd.f32 %v1880_v13, %v1879_v38 }
 0x154   : > { %v1882_v34 = vmul.f32 0.0078125, %v1881_v31 }
 0x156   : > { %v1885_v44 = vadd.f32 1e-05, %v1882_v34 }
 0x158   : > { %2503 = vrsqrt.f32 %v1885_v44 }
 0x165   : > { %v2504_v50 = vpop.eup %2503 }
 0x166   : > { %v1887_v60 = vmul.f32 %v2504_v50, %v1883_v17 }
 0x168   : > { %v1892_v27 = vrot.slane %v1887_v60, %v4547_v56 }
 0x16a   : > { %v1894_v24 = vmul.f32 %v1892_v27, %v3907_v37  ;;  %v1895_v51 = vmul.f32 %v1892_v27, %v3909_v61  ;;  %v1896_v33 = vmul.f32 %v1892_v27, %v3911_v3  ;;  %v1897_v20 = vmul.f32 %v1892_v27, %v3913_v18 }
 0x16b   : > { %v1898_v62 = vmul.f32 %v1892_v27, %v1833_v5  ;;  %v1899_v10 = vmul.f32 %v1892_v27, %v1834_v12  ;;  %v1900_v45 = vmul.f32 %v1892_v27, %v1835_v15  ;;  %v1901_v32 = vmul.f32 %v1892_v27, %v1836_v16 }
 0x16c   : > { %v1902_v21 = vmul.f32 %v1892_v27, %v3915_v43  ;;  %v1903_v63 = vmul.f32 %v1892_v27, %v3917_v54  ;;  %v1904_v59 = vmul.f32 %v1892_v27, %v3919_v58  ;;  %v1905_v6 = vmul.f32 %v1892_v27, %v3921_v52 }
 0x16d   : > { %v1906_v37 = vmul.f32 %v1892_v27, %v3923_v23  ;;  %v1907_v61 = vmul.f32 %v1892_v27, %v3931_v48  ;;  %v1908_v3 = vmul.f32 %v1892_v27, %v1843_v25  ;;  %v1909_v22 = vmul.f32 %v1892_v27, %v1844_v0 }
 0x16e   : > { %v1916_v18 = vadd.f32 %v2470_v39, %v1894_v24  ;;  %v1917_v53 = vadd.f32 %v2470_v39, %v1895_v51  ;;  %v1918_v5 = vadd.f32 %v2470_v39, %v1896_v33  ;;  %v1919_v12 = vadd.f32 %v2470_v39, %v1897_v20 }
 0x16f   : > { %v1920_v15 = vadd.f32 %v2470_v39, %v1898_v62  ;;  %v1921_v19 = vadd.f32 %v2470_v39, %v1899_v10  ;;  %v1922_v47 = vadd.f32 %v2470_v39, %v1900_v45  ;;  %v1923_v43 = vadd.f32 %v2470_v39, %v1901_v32 }
 0x170   : > { %v1924_v16 = vadd.f32 %v2470_v39, %v1902_v21  ;;  %v1925_v54 = vadd.f32 %v2470_v39, %v1903_v63  ;;  %v1926_v42 = vadd.f32 %v2470_v39, %v1904_v59  ;;  %v1927_v58 = vadd.f32 %v2470_v39, %v1905_v6  ;;  %1932 = vst [vmem:[%s3967_s5] sm:$0xff] %v1916_v18 }
 0x171   : > { %1933 = vst [vmem:[%s3967_s5 + $0x8] sm:$0xff] %v1917_v53  ;;  %1934 = vst [vmem:[%s3967_s5 + $0x10] sm:$0xff] %v1918_v5  ;;  %v1928_v52 = vadd.f32 %v2470_v39, %v1906_v37  ;;  %v1929_v23 = vadd.f32 %v2470_v39, %v1907_v61  ;;  %v1930_v48 = vadd.f32 %v2470_v39, %v1908_v3 }
 0x172   : > { %1935 = vst [vmem:[%s3967_s5 + $0x18] sm:$0xff] %v1919_v12  ;;  %v1931_v25 = vadd.f32 %v2470_v39, %v1909_v22  ;;  %1936 = vst [vmem:[%s3967_s5 + $0x20] sm:$0xff] %v1920_v15 }
 0x173   : > { %1937 = vst [vmem:[%s3967_s5 + $0x28] sm:$0xff] %v1921_v19  ;;  %1938 = vst [vmem:[%s3967_s5 + $0x30] sm:$0xff] %v1922_v47 }
 0x174   : > { %1939 = vst [vmem:[%s3967_s5 + $0x38] sm:$0xff] %v1923_v43  ;;  %1940 = vst [vmem:[%s3967_s5 + $0x40] sm:$0xff] %v1924_v16  ;;  %1954 = sbr.rel (!%p2589_p5) target bundleno = 385 (0x181), region = 116 }
 0x175   : > { %1941 = vst [vmem:[%s3967_s5 + $0x48] sm:$0xff] %v1925_v54  ;;  %1942 = vst [vmem:[%s3967_s5 + $0x50] sm:$0xff] %v1926_v42 }
 0x176   : > { %1943 = vst [vmem:[%s3967_s5 + $0x58] sm:$0xff] %v1927_v58  ;;  %1944 = vst [vmem:[%s3967_s5 + $0x60] sm:$0xff] %v1928_v52 }
 0x177   : > { %1945 = vst [vmem:[%s3967_s5 + $0x68] sm:$0xff] %v1929_v23  ;;  %1946 = vst [vmem:[%s3967_s5 + $0x70] sm:$0xff] %v1930_v48  ;;  %v2015_v0 = vld [vmem:[%s3967_s5] sm:$0xff] (%p2589_p5) }
 0x178   : > { %1947 = vst [vmem:[%s3967_s5 + $0x78] sm:$0xff] %v1931_v25  ;;  %v2017_v30 = vld [vmem:[%s3967_s5 + $0x8] sm:$0xff] (%p2589_p5)  ;;  %v2019_v46 = vld [vmem:[%s3967_s5 + $0x10] sm:$0xff] (%p2589_p5)  ;;  %2016 = vst [vmem:[%s1956_s9] sm:$0xff] (%p2589_p5), %v2015_v0 }
 0x179   : > { %v2021_v49 = vld [vmem:[%s3967_s5 + $0x18] sm:$0xff]  ;;  %v2023_v35 = vld [vmem:[%s3967_s5 + $0x20] sm:$0xff]  ;;  %2018 = vst [vmem:[%s1956_s9 + $0x10] sm:$0xff] %v2017_v30  ;;  %2020 = vst [vmem:[%s1956_s9 + $0x20] sm:$0xff] %v2019_v46 }
 0x17a   : > { %v2025_v28 = vld [vmem:[%s3967_s5 + $0x28] sm:$0xff]  ;;  %2022 = vst [vmem:[%s1956_s9 + $0x30] sm:$0xff] %v2021_v49  ;;  %2024 = vst [vmem:[%s1956_s9 + $0x40] sm:$0xff] %v2023_v35  ;;  %v2027_v1 = vld [vmem:[%s3967_s5 + $0x30] sm:$0xff] }
 0x17b   : > { %2026 = vst [vmem:[%s1956_s9 + $0x50] sm:$0xff] %v2025_v28  ;;  %v2029_v29 = vld [vmem:[%s3967_s5 + $0x38] sm:$0xff]  ;;  %v2031_v55 = vld [vmem:[%s3967_s5 + $0x40] sm:$0xff]  ;;  %2028 = vst [vmem:[%s1956_s9 + $0x60] sm:$0xff] %v2027_v1 }
 0x17c   : > { %2030 = vst [vmem:[%s1956_s9 + $0x70] sm:$0xff] %v2029_v29  ;;  %2032 = vst [vmem:[%s1956_s9 + $0x80] sm:$0xff] %v2031_v55  ;;  %v2033_v57 = vld [vmem:[%s3967_s5 + $0x48] sm:$0xff]  ;;  %v2035_v9 = vld [vmem:[%s3967_s5 + $0x50] sm:$0xff] }
 0x17d   : > { %v2037_v14 = vld [vmem:[%s3967_s5 + $0x58] sm:$0xff]  ;;  %2034 = vst [vmem:[%s1956_s9 + $0x90] sm:$0xff] %v2033_v57  ;;  %2036 = vst [vmem:[%s1956_s9 + $0xa0] sm:$0xff] %v2035_v9  ;;  %v2039_v4 = vld [vmem:[%s3967_s5 + $0x60] sm:$0xff] }
 0x17e   : > { %2038 = vst [vmem:[%s1956_s9 + $0xb0] sm:$0xff] %v2037_v14  ;;  %v2041_v2 = vld [vmem:[%s3967_s5 + $0x68] sm:$0xff]  ;;  %v2043_v11 = vld [vmem:[%s3967_s5 + $0x70] sm:$0xff]  ;;  %2040 = vst [vmem:[%s1956_s9 + $0xc0] sm:$0xff] %v2039_v4 }
 0x17f   : > { %2042 = vst [vmem:[%s1956_s9 + $0xd0] sm:$0xff] %v2041_v2  ;;  %2044 = vst [vmem:[%s1956_s9 + $0xe0] sm:$0xff] %v2043_v11  ;;  %v2045_v26 = vld [vmem:[%s3967_s5 + $0x78] sm:$0xff] }
 0x180   : > { %2046 = vst [vmem:[%s1956_s9 + $0xf0] sm:$0xff] %v2045_v26 }
 0x181 PF: > { %p11_p11 = scmp.ge.s32.totalorder %s2573_s19, 4   ;;  %s4548_s15 = smov %s2523_s16 }
 0x182   : > { %s4549_s16 = smov %s2583_s22  ;;  %s4550_s17 = smov %s2573_s19 }
 0x183   :  { %13 = sbr.rel (!%p11_p11) target bundleno = 2 (0x2), region = 203 }

</bundles_post_ra>
